<compile_context>
chip_gen: v7x
topology: tpu7x:2x2x1
jax: 0.10.0
libtpu: 0.0.40
codegen_flags: <defaults>
</compile_context>

<pallas_src>
import math

import jax
import jax.numpy as jnp
from jax.experimental import pallas as pl
from jax.experimental.pallas import tpu as pltpu

IN_DIM = 784            # 1 * 28 * 28
HID = 400
HID_PAD = 512           # 4 * 128 -> lane-dense h1 / h3 tiles
LATENT = 20
PACK = 128              # lane width of the packed mu/logvar/z slabs
LOGVAR_COL = 64         # logvar lives at lanes [64, 84) of the packed slab


def vae_kernel(x_ref, eps_ref,
               w1_ref, b1_ref,
               wml_ref, bml_ref,
               wlv_ref, blv_ref,
               w3_ref, b3_ref,
               w4_ref, b4_ref,
               recon_ref, mulv_ref, z_ref):
    # x arrives as raw f32 (tile_b, 784); cast to bf16 in-kernel (halves the
    # MXU input width, avoids a wrapper-side pad/cast pass over the batch).
    x = x_ref[...].astype(jnp.bfloat16)

    # ---- encode: h1 = relu(x @ W1 + b1) ----------------------------------
    h1 = jnp.dot(x, w1_ref[...], preferred_element_type=jnp.float32) + b1_ref[...]
    h1 = jnp.maximum(h1, 0.0).astype(jnp.bfloat16)            # (tb, 512)

    # ---- mu / logvar -------------------------------------------------------
    # mulv packs mu @ lanes [0,20) and logvar @ lanes [64,84) (one lane-dense
    # 128-wide output slab).  lv_al is the same logvar projection but aligned
    # to lanes [0,20) so the reparameterization needs no cross-lane shift.
    mulv = jnp.dot(h1, wml_ref[...], preferred_element_type=jnp.float32) + bml_ref[...]
    lv_al = jnp.dot(h1, wlv_ref[...], preferred_element_type=jnp.float32) + blv_ref[...]

    # ---- reparameterize: z = mu + exp(logvar) * eps ------------------------
    # eps is zero outside lanes [0,20) and lv_al is zero there (exp(0)=1), so
    #   z128 = [ z | 0 | logvar | 0 ]  (finite; no exp of mu anywhere).
    z128 = mulv + jnp.exp(lv_al) * eps_ref[...]               # (tb, 128) f32

    # ---- decode: sigmoid(relu(z @ W3 + b3) @ W4 + b4) ----------------------
    # w3 rows outside [0,20) are zero, so the extra (logvar) lanes of z128
    # contribute nothing: this is exactly relu(z @ W3 + b3).
    h3 = jnp.dot(z128.astype(jnp.bfloat16), w3_ref[...],
                 preferred_element_type=jnp.float32) + b3_ref[...]
    h3 = jnp.maximum(h3, 0.0).astype(jnp.bfloat16)            # (tb, 512)
    logits = jnp.dot(h3, w4_ref[...], preferred_element_type=jnp.float32) + b4_ref[...]
    # f32 sigmoid (exp could be done in bf16 on v6e/v7x if the EUP ever shows
    # up as the limiter in a bundle dump; kernel is HBM-bound today).
    recon = 1.0 / (1.0 + jnp.exp(-logits))                    # (tb, 784) f32

    recon_ref[...] = recon.astype(jnp.bfloat16)               # bf16 writeback
    mulv_ref[...] = mulv        # [ mu | 0 | logvar | 0 ]
    z_ref[...] = z128           # [ z  | 0 | logvar | 0 ]


def init_params(key):
    """Deterministic init matching nn.Linear default: U(-1/sqrt(fan_in), +)."""
    def linear(key, fan_in, fan_out):
        kw, kb = jax.random.split(key)
        bound = 1.0 / math.sqrt(fan_in)
        w = jax.random.uniform(kw, (fan_in, fan_out), jnp.float32, -bound, bound)
        b = jax.random.uniform(kb, (1, fan_out), jnp.float32, -bound, bound)
        return w, b

    k1, k21, k22, k3, k4 = jax.random.split(key, 5)
    w1, b1 = linear(k1, IN_DIM, HID)
    w21, b21 = linear(k21, HID, LATENT)
    w22, b22 = linear(k22, HID, LATENT)
    w3, b3 = linear(k3, LATENT, HID)
    w4, b4 = linear(k4, HID, IN_DIM)
    return (w1, b1, w21, b21, w22, b22, w3, b3, w4, b4)


def prepare_params(params):
    """Cast weights to bf16 and re-pack into the padded / packed layouts the
    kernel expects.  Call once; reuse for every forward call."""
    w1, b1, w21, b21, w22, b22, w3, b3, w4, b4 = params
    f32, bf = jnp.float32, jnp.bfloat16

    # encoder: 784 -> 512 (cols [400,512) zero => h1 padding cols are 0)
    w1p = jnp.zeros((IN_DIM, HID_PAD), f32).at[:, :HID].set(w1).astype(bf)
    b1p = jnp.zeros((1, HID_PAD), f32).at[:, :HID].set(b1)

    # packed mu/logvar projection: mu @ [0,20), logvar @ [64,84)
    wml = jnp.zeros((HID_PAD, PACK), f32)
    wml = wml.at[:HID, :LATENT].set(w21)
    wml = wml.at[:HID, LOGVAR_COL:LOGVAR_COL + LATENT].set(w22)
    wml = wml.astype(bf)
    bml = jnp.zeros((1, PACK), f32)
    bml = bml.at[:, :LATENT].set(b21)
    bml = bml.at[:, LOGVAR_COL:LOGVAR_COL + LATENT].set(b22)

    # logvar aligned to lanes [0,20) (for the reparameterization)
    wlv = jnp.zeros((HID_PAD, PACK), f32).at[:HID, :LATENT].set(w22).astype(bf)
    blv = jnp.zeros((1, PACK), f32).at[:, :LATENT].set(b22)

    # decoder: 128 (z slab) -> 512 -> 784
    w3p = jnp.zeros((PACK, HID_PAD), f32).at[:LATENT, :HID].set(w3).astype(bf)
    b3p = jnp.zeros((1, HID_PAD), f32).at[:, :HID].set(b3)
    w4p = jnp.zeros((HID_PAD, IN_DIM), f32).at[:HID].set(w4).astype(bf)
    b4p = b4.astype(f32)

    return (w1p, b1p, wml, bml, wlv, blv, w3p, b3p, w4p, b4p)


def _round_up(n, m):
    return ((n + m - 1) // m) * m


def _pick_tile_b(B, requested):
    """Batch-tile picker: multiple of 16 (bf16 sublane packing), prefers a
    divisor of the batch (no pad copy), keeps >=2 grid steps for big batches
    (v7x has 2 TensorCores under dimension_semantics=('parallel',))."""
    req = max(16, (min(int(requested), 2048) // 16) * 16)
    bp = _round_up(B, 16)
    if bp <= req:
        # Whole batch fits in one tile; split in two when it is big enough.
        return _round_up(pl.cdiv(bp, 2), 16) if bp >= 128 else bp
    # Prefer a tile that evenly divides the 16-rounded batch.
    for t in range(req, req // 2, -16):
        if bp % t == 0:
            return t
    # Otherwise balance tiles so batch padding stays small.
    n = pl.cdiv(bp, req)
    return _round_up(pl.cdiv(bp, n), 16)


def vae_forward(x_nchw, eps, prepared, tile_b=1024):
    """Fused VAE forward.  x_nchw: (B, 1, 28, 28) f32; eps: (B, 20) f32.

    Returns (recon[bf16], mu, logvar, z) with recon (B, 784) and the rest
    (B, 20) float32.
    """
    B = x_nchw.shape[0]
    w1, b1, wml, bml, wlv, blv, w3, b3, w4, b4 = prepared

    # Reshape only (no pad / cast pass over the big input); eps is tiny so
    # padding it to a 128-lane slab in the wrapper is cheap.
    x_flat = x_nchw.reshape(B, IN_DIM)
    eps_pad = jnp.pad(eps.astype(jnp.float32), ((0, 0), (0, PACK - LATENT)))

    tile = _pick_tile_b(B, tile_b)
    bp = _round_up(B, tile)
    if bp != B:
        x_flat = jnp.pad(x_flat, ((0, bp - B), (0, 0)))
        eps_pad = jnp.pad(eps_pad, ((0, bp - B), (0, 0)))
    n_tiles = bp // tile

    def batched(feat):
        return pl.BlockSpec((tile, feat), lambda i: (i, 0))

    def resident(arr):
        # Constant index_map -> weights/biases stay VMEM-resident across the
        # batch grid (DMA'd from HBM once; ~1.7 MiB of bf16 total).
        return pl.BlockSpec(arr.shape, lambda i: (0,) * arr.ndim)

    in_specs = [batched(IN_DIM), batched(PACK)] + [
        resident(a) for a in (w1, b1, wml, bml, wlv, blv, w3, b3, w4, b4)
    ]
    out_shapes = (
        jax.ShapeDtypeStruct((bp, IN_DIM), jnp.bfloat16),  # recon (bf16, 784 wide)
        jax.ShapeDtypeStruct((bp, PACK), jnp.float32),     # [mu | 0 | logvar | 0]
        jax.ShapeDtypeStruct((bp, PACK), jnp.float32),     # [z  | 0 | logvar | 0]
    )
    out_specs = [batched(IN_DIM), batched(PACK), batched(PACK)]

    recon_p, mulv, z128 = pl.pallas_call(
        vae_kernel,
        out_shape=out_shapes,
        grid_spec=pltpu.PrefetchScalarGridSpec(
            num_scalar_prefetch=0,
            grid=(n_tiles,),
            in_specs=in_specs,
            out_specs=out_specs,
        ),
        compiler_params=pltpu.CompilerParams(
            # Batch tiles are independent -> shard across both TCs on v7x.
            dimension_semantics=("parallel",),
            # tile_b=1024 double-buffered needs ~16 MiB of pipeline buffers
            # plus intermediates; 40 MiB leaves headroom on v7x's 64 MiB/TC
            # and is far below v5e/v6e's 128 MiB.  (Raise toward 64 MiB if
            # pushing tile_b=2048 on v5e/v6e.)
            vmem_limit_bytes=40 << 20,
        ),
    )(x_flat, eps_pad, w1, b1, wml, bml, wlv, blv, w3, b3, w4, b4)

    recon = recon_p if bp == B else recon_p[:B]
    mu = mulv[:B, :LATENT]
    logvar = mulv[:B, LOGVAR_COL:LOGVAR_COL + LATENT]
    z = z128[:B, :LATENT]
    return recon, mu, logvar, z


def vae_forward_ref(x_nchw, eps, params):
    """Pure-JAX reference with the same bf16 casting pattern as the kernel."""
    w1, b1, w21, b21, w22, b22, w3, b3, w4, b4 = params
    bf = jnp.bfloat16
    x = x_nchw.reshape(x_nchw.shape[0], -1).astype(bf)
    h1 = jnp.maximum(
        jnp.dot(x, w1.astype(bf), preferred_element_type=jnp.float32) + b1, 0.0
    ).astype(bf)
    mu = jnp.dot(h1, w21.astype(bf), preferred_element_type=jnp.float32) + b21
    logvar = jnp.dot(h1, w22.astype(bf), preferred_element_type=jnp.float32) + b22
    z = mu + jnp.exp(logvar) * eps
    h3 = jnp.maximum(
        jnp.dot(z.astype(bf), w3.astype(bf), preferred_element_type=jnp.float32) + b3, 0.0
    ).astype(bf)
    recon = jax.nn.sigmoid(
        jnp.dot(h3, w4.astype(bf), preferred_element_type=jnp.float32) + b4)
    return recon, mu, logvar, z


if __name__ == "__main__":
    key = jax.random.PRNGKey(0)
    params = init_params(key)
    prepared = prepare_params(params)

    def check(B, tile_b):
        kx, ke = jax.random.split(jax.random.fold_in(key, B))
        x = jax.random.uniform(kx, (B, 1, 28, 28), jnp.float32)   # NCHW, like MNIST
        eps = jax.random.normal(ke, (B, LATENT), jnp.float32)     # reparam noise

        recon, mu, logvar, z = jax.block_until_ready(
            vae_forward(x, eps, prepared, tile_b=tile_b))
        r_ref, m_ref, lv_ref, z_ref = vae_forward_ref(x, eps, params)

        assert recon.shape == (B, IN_DIM) and recon.dtype == jnp.bfloat16
        assert mu.shape == (B, LATENT) and z.shape == (B, LATENT)
        # bf16 matmuls / bf16 recon output -> loosened tolerances.
        assert jnp.allclose(recon.astype(jnp.float32), r_ref,
                            atol=2e-2, rtol=2e-2), "recon mismatch"
        assert jnp.allclose(mu, m_ref, atol=2e-2, rtol=2e-2), "mu mismatch"
        assert jnp.allclose(logvar, lv_ref, atol=2e-2, rtol=2e-2), "logvar mismatch"
        assert jnp.allclose(z, z_ref, atol=2e-2, rtol=2e-2), "z mismatch"

    check(B=16, tile_b=1024)   # small batch: single tile
    check(B=48, tile_b=16)     # multi-tile path: weight residency across grid steps

    print("KERNEL_OK")
</pallas_src>

<mosaic_0001>
module attributes {stable_mosaic.version = 11 : i64} {
  func.func @vae_kernel(%arg0: i32, %arg1: memref<16x784xf32, #tpu.memory_space<vmem>>, %arg2: memref<16x128xf32, #tpu.memory_space<vmem>>, %arg3: memref<784x512xbf16, #tpu.memory_space<vmem>>, %arg4: memref<1x512xf32, #tpu.memory_space<vmem>>, %arg5: memref<512x128xbf16, #tpu.memory_space<vmem>>, %arg6: memref<1x128xf32, #tpu.memory_space<vmem>>, %arg7: memref<512x128xbf16, #tpu.memory_space<vmem>>, %arg8: memref<1x128xf32, #tpu.memory_space<vmem>>, %arg9: memref<128x512xbf16, #tpu.memory_space<vmem>>, %arg10: memref<1x512xf32, #tpu.memory_space<vmem>>, %arg11: memref<512x784xbf16, #tpu.memory_space<vmem>>, %arg12: memref<1x784xf32, #tpu.memory_space<vmem>>, %arg13: memref<16x784xbf16, #tpu.memory_space<vmem>>, %arg14: memref<16x128xf32, #tpu.memory_space<vmem>>, %arg15: memref<16x128xf32, #tpu.memory_space<vmem>>) attributes {dimension_semantics = [#tpu.dimension_semantics<parallel>], iteration_bounds = array<i64: 1>, scalar_prefetch = 0 : i64, scratch_operands = 0 : i64, tpu.core_type = #tpu.core_type<tc>, window_params = [{transform_indices = @transform_0, window_bounds = array<i64: 16, 784>}, {transform_indices = @transform_1, window_bounds = array<i64: 16, 128>}, {pipeline_mode = #tpu.pipeline_mode<synchronous>, transform_indices = @transform_2, window_bounds = array<i64: 784, 512>}, {pipeline_mode = #tpu.pipeline_mode<synchronous>, transform_indices = @transform_3, window_bounds = array<i64: 1, 512>}, {pipeline_mode = #tpu.pipeline_mode<synchronous>, transform_indices = @transform_4, window_bounds = array<i64: 512, 128>}, {pipeline_mode = #tpu.pipeline_mode<synchronous>, transform_indices = @transform_5, window_bounds = array<i64: 1, 128>}, {pipeline_mode = #tpu.pipeline_mode<synchronous>, transform_indices = @transform_6, window_bounds = array<i64: 512, 128>}, {pipeline_mode = #tpu.pipeline_mode<synchronous>, transform_indices = @transform_7, window_bounds = array<i64: 1, 128>}, {pipeline_mode = #tpu.pipeline_mode<synchronous>, transform_indices = @transform_8, window_bounds = array<i64: 128, 512>}, {pipeline_mode = #tpu.pipeline_mode<synchronous>, transform_indices = @transform_9, window_bounds = array<i64: 1, 512>}, {pipeline_mode = #tpu.pipeline_mode<synchronous>, transform_indices = @transform_10, window_bounds = array<i64: 512, 784>}, {pipeline_mode = #tpu.pipeline_mode<synchronous>, transform_indices = @transform_11, window_bounds = array<i64: 1, 784>}, {transform_indices = @transform_12, window_bounds = array<i64: 16, 784>}, {transform_indices = @transform_13, window_bounds = array<i64: 16, 128>}, {transform_indices = @transform_14, window_bounds = array<i64: 16, 128>}]} {
    %c0 = arith.constant 0 : index
    %c0_0 = arith.constant 0 : index
    %0 = vector.load %arg1[%c0, %c0_0] : memref<16x784xf32, #tpu.memory_space<vmem>>, vector<16x784xf32>
    %1 = arith.truncf %0 : vector<16x784xf32> to vector<16x784xbf16>
    %c0_1 = arith.constant 0 : index
    %c0_2 = arith.constant 0 : index
    %2 = vector.load %arg3[%c0_1, %c0_2] : memref<784x512xbf16, #tpu.memory_space<vmem>>, vector<784x512xbf16>
    %cst = arith.constant dense<0.000000e+00> : vector<16x512xf32>
    %3 = tpu.matmul %1, %2, %cst {dimension_numbers = #tpu.dot_dimension_numbers<[1], [0], [0], [1], [0, 0, 1, 1], [], []>} : vector<16x784xbf16>, vector<784x512xbf16>, vector<16x512xf32> -> vector<16x512xf32>
    %c0_3 = arith.constant 0 : index
    %c0_4 = arith.constant 0 : index
    %4 = vector.load %arg4[%c0_3, %c0_4] : memref<1x512xf32, #tpu.memory_space<vmem>>, vector<1x512xf32>
    %5 = vector.broadcast %4 : vector<1x512xf32> to vector<16x512xf32>
    %6 = arith.addf %3, %5 : vector<16x512xf32>
    %cst_5 = arith.constant 0.000000e+00 : f32
    %7 = vector.broadcast %cst_5 : f32 to vector<16x512xf32>
    %8 = arith.maximumf %6, %7 : vector<16x512xf32>
    %9 = arith.truncf %8 : vector<16x512xf32> to vector<16x512xbf16>
    %c0_6 = arith.constant 0 : index
    %c0_7 = arith.constant 0 : index
    %10 = vector.load %arg5[%c0_6, %c0_7] : memref<512x128xbf16, #tpu.memory_space<vmem>>, vector<512x128xbf16>
    %cst_8 = arith.constant dense<0.000000e+00> : vector<16x128xf32>
    %11 = tpu.matmul %9, %10, %cst_8 {dimension_numbers = #tpu.dot_dimension_numbers<[1], [0], [0], [1], [0, 0, 1, 1], [], []>} : vector<16x512xbf16>, vector<512x128xbf16>, vector<16x128xf32> -> vector<16x128xf32>
    %c0_9 = arith.constant 0 : index
    %c0_10 = arith.constant 0 : index
    %12 = vector.load %arg6[%c0_9, %c0_10] : memref<1x128xf32, #tpu.memory_space<vmem>>, vector<1x128xf32>
    %13 = vector.broadcast %12 : vector<1x128xf32> to vector<16x128xf32>
    %14 = arith.addf %11, %13 : vector<16x128xf32>
    %c0_11 = arith.constant 0 : index
    %c0_12 = arith.constant 0 : index
    %15 = vector.load %arg7[%c0_11, %c0_12] : memref<512x128xbf16, #tpu.memory_space<vmem>>, vector<512x128xbf16>
    %cst_13 = arith.constant dense<0.000000e+00> : vector<16x128xf32>
    %16 = tpu.matmul %9, %15, %cst_13 {dimension_numbers = #tpu.dot_dimension_numbers<[1], [0], [0], [1], [0, 0, 1, 1], [], []>} : vector<16x512xbf16>, vector<512x128xbf16>, vector<16x128xf32> -> vector<16x128xf32>
    %c0_14 = arith.constant 0 : index
    %c0_15 = arith.constant 0 : index
    %17 = vector.load %arg8[%c0_14, %c0_15] : memref<1x128xf32, #tpu.memory_space<vmem>>, vector<1x128xf32>
    %18 = vector.broadcast %17 : vector<1x128xf32> to vector<16x128xf32>
    %19 = arith.addf %16, %18 : vector<16x128xf32>
    %20 = math.exp %19 : vector<16x128xf32>
    %c0_16 = arith.constant 0 : index
    %c0_17 = arith.constant 0 : index
    %21 = vector.load %arg2[%c0_16, %c0_17] : memref<16x128xf32, #tpu.memory_space<vmem>>, vector<16x128xf32>
    %22 = arith.mulf %20, %21 : vector<16x128xf32>
    %23 = arith.addf %14, %22 : vector<16x128xf32>
    %24 = arith.truncf %23 : vector<16x128xf32> to vector<16x128xbf16>
    %c0_18 = arith.constant 0 : index
    %c0_19 = arith.constant 0 : index
    %25 = vector.load %arg9[%c0_18, %c0_19] : memref<128x512xbf16, #tpu.memory_space<vmem>>, vector<128x512xbf16>
    %cst_20 = arith.constant dense<0.000000e+00> : vector<16x512xf32>
    %26 = tpu.matmul %24, %25, %cst_20 {dimension_numbers = #tpu.dot_dimension_numbers<[1], [0], [0], [1], [0, 0, 1, 1], [], []>} : vector<16x128xbf16>, vector<128x512xbf16>, vector<16x512xf32> -> vector<16x512xf32>
    %c0_21 = arith.constant 0 : index
    %c0_22 = arith.constant 0 : index
    %27 = vector.load %arg10[%c0_21, %c0_22] : memref<1x512xf32, #tpu.memory_space<vmem>>, vector<1x512xf32>
    %28 = vector.broadcast %27 : vector<1x512xf32> to vector<16x512xf32>
    %29 = arith.addf %26, %28 : vector<16x512xf32>
    %cst_23 = arith.constant 0.000000e+00 : f32
    %30 = vector.broadcast %cst_23 : f32 to vector<16x512xf32>
    %31 = arith.maximumf %29, %30 : vector<16x512xf32>
    %32 = arith.truncf %31 : vector<16x512xf32> to vector<16x512xbf16>
    %c0_24 = arith.constant 0 : index
    %c0_25 = arith.constant 0 : index
    %33 = vector.load %arg11[%c0_24, %c0_25] : memref<512x784xbf16, #tpu.memory_space<vmem>>, vector<512x784xbf16>
    %cst_26 = arith.constant dense<0.000000e+00> : vector<16x784xf32>
    %34 = tpu.matmul %32, %33, %cst_26 {dimension_numbers = #tpu.dot_dimension_numbers<[1], [0], [0], [1], [0, 0, 1, 1], [], []>} : vector<16x512xbf16>, vector<512x784xbf16>, vector<16x784xf32> -> vector<16x784xf32>
    %c0_27 = arith.constant 0 : index
    %c0_28 = arith.constant 0 : index
    %35 = vector.load %arg12[%c0_27, %c0_28] : memref<1x784xf32, #tpu.memory_space<vmem>>, vector<1x784xf32>
    %36 = vector.broadcast %35 : vector<1x784xf32> to vector<16x784xf32>
    %37 = arith.addf %34, %36 : vector<16x784xf32>
    %cst_29 = arith.constant 0.000000e+00 : f32
    %38 = vector.broadcast %cst_29 : f32 to vector<16x784xf32>
    %39 = arith.subf %38, %37 : vector<16x784xf32>
    %40 = math.exp %39 : vector<16x784xf32>
    %cst_30 = arith.constant 1.000000e+00 : f32
    %41 = vector.broadcast %cst_30 : f32 to vector<16x784xf32>
    %42 = arith.addf %41, %40 : vector<16x784xf32>
    %cst_31 = arith.constant 1.000000e+00 : f32
    %43 = vector.broadcast %cst_31 : f32 to vector<16x784xf32>
    %44 = arith.divf %43, %42 : vector<16x784xf32>
    %45 = arith.truncf %44 : vector<16x784xf32> to vector<16x784xbf16>
    %c0_32 = arith.constant 0 : index
    %c0_33 = arith.constant 0 : index
    %46 = vector.load %arg13[%c0_32, %c0_33] : memref<16x784xbf16, #tpu.memory_space<vmem>>, vector<16x784xbf16>
    tpu.vector_store %arg13[%c0_32, %c0_33], %45 {strides = array<i32>} : memref<16x784xbf16, #tpu.memory_space<vmem>>, vector<16x784xbf16>,
    %c0_34 = arith.constant 0 : index
    %c0_35 = arith.constant 0 : index
    %47 = vector.load %arg14[%c0_34, %c0_35] : memref<16x128xf32, #tpu.memory_space<vmem>>, vector<16x128xf32>
    tpu.vector_store %arg14[%c0_34, %c0_35], %14 {strides = array<i32>} : memref<16x128xf32, #tpu.memory_space<vmem>>, vector<16x128xf32>,
    %c0_36 = arith.constant 0 : index
    %c0_37 = arith.constant 0 : index
    %48 = vector.load %arg15[%c0_36, %c0_37] : memref<16x128xf32, #tpu.memory_space<vmem>>, vector<16x128xf32>
    tpu.vector_store %arg15[%c0_36, %c0_37], %23 {strides = array<i32>} : memref<16x128xf32, #tpu.memory_space<vmem>>, vector<16x128xf32>,
    return
  }
  func.func @transform_0(%arg0: i32) -> (i32, i32) {
    %c0_i32 = arith.constant 0 : i32
    %c0_i32_0 = arith.constant 0 : i32
    return %arg0, %c0_i32 : i32, i32
  }
  func.func @transform_1(%arg0: i32) -> (i32, i32) {
    %c0_i32 = arith.constant 0 : i32
    %c0_i32_0 = arith.constant 0 : i32
    return %arg0, %c0_i32 : i32, i32
  }
  func.func @transform_2(%arg0: i32) -> (i32, i32) {
    %c0_i32 = arith.constant 0 : i32
    %c0_i32_0 = arith.constant 0 : i32
    %c0_i32_1 = arith.constant 0 : i32
    return %c0_i32, %c0_i32_0 : i32, i32
  }
  func.func @transform_3(%arg0: i32) -> (i32, i32) {
    %c0_i32 = arith.constant 0 : i32
    %c0_i32_0 = arith.constant 0 : i32
    %c0_i32_1 = arith.constant 0 : i32
    return %c0_i32, %c0_i32_0 : i32, i32
  }
  func.func @transform_4(%arg0: i32) -> (i32, i32) {
    %c0_i32 = arith.constant 0 : i32
    %c0_i32_0 = arith.constant 0 : i32
    %c0_i32_1 = arith.constant 0 : i32
    return %c0_i32, %c0_i32_0 : i32, i32
  }
  func.func @transform_5(%arg0: i32) -> (i32, i32) {
    %c0_i32 = arith.constant 0 : i32
    %c0_i32_0 = arith.constant 0 : i32
    %c0_i32_1 = arith.constant 0 : i32
    return %c0_i32, %c0_i32_0 : i32, i32
  }
  func.func @transform_6(%arg0: i32) -> (i32, i32) {
    %c0_i32 = arith.constant 0 : i32
    %c0_i32_0 = arith.constant 0 : i32
    %c0_i32_1 = arith.constant 0 : i32
    return %c0_i32, %c0_i32_0 : i32, i32
  }
  func.func @transform_7(%arg0: i32) -> (i32, i32) {
    %c0_i32 = arith.constant 0 : i32
    %c0_i32_0 = arith.constant 0 : i32
    %c0_i32_1 = arith.constant 0 : i32
    return %c0_i32, %c0_i32_0 : i32, i32
  }
  func.func @transform_8(%arg0: i32) -> (i32, i32) {
    %c0_i32 = arith.constant 0 : i32
    %c0_i32_0 = arith.constant 0 : i32
    %c0_i32_1 = arith.constant 0 : i32
    return %c0_i32, %c0_i32_0 : i32, i32
  }
  func.func @transform_9(%arg0: i32) -> (i32, i32) {
    %c0_i32 = arith.constant 0 : i32
    %c0_i32_0 = arith.constant 0 : i32
    %c0_i32_1 = arith.constant 0 : i32
    return %c0_i32, %c0_i32_0 : i32, i32
  }
  func.func @transform_10(%arg0: i32) -> (i32, i32) {
    %c0_i32 = arith.constant 0 : i32
    %c0_i32_0 = arith.constant 0 : i32
    %c0_i32_1 = arith.constant 0 : i32
    return %c0_i32, %c0_i32_0 : i32, i32
  }
  func.func @transform_11(%arg0: i32) -> (i32, i32) {
    %c0_i32 = arith.constant 0 : i32
    %c0_i32_0 = arith.constant 0 : i32
    %c0_i32_1 = arith.constant 0 : i32
    return %c0_i32, %c0_i32_0 : i32, i32
  }
  func.func @transform_12(%arg0: i32) -> (i32, i32) {
    %c0_i32 = arith.constant 0 : i32
    %c0_i32_0 = arith.constant 0 : i32
    return %arg0, %c0_i32 : i32, i32
  }
  func.func @transform_13(%arg0: i32) -> (i32, i32) {
    %c0_i32 = arith.constant 0 : i32
    %c0_i32_0 = arith.constant 0 : i32
    return %arg0, %c0_i32 : i32, i32
  }
  func.func @transform_14(%arg0: i32) -> (i32, i32) {
    %c0_i32 = arith.constant 0 : i32
    %c0_i32_0 = arith.constant 0 : i32
    return %arg0, %c0_i32 : i32, i32
  }
}

</mosaic_0001>

<bundles_post_ra>
// kernel: tpu_custom_call.1
= control target key start
LH: loop header
LB: loop body
LE: loop exit
PB: predicated region body
PF: predicated region fallthrough
CT: control target
= control target key end

     0   :  { %20 = vsyncpa [#allocation3], 0  ;;  %vm1266_vm0 = vcmask 130048   ;;  %s8000_s0 = inlined_call_operand.vmem [shape: f32[16,784], index: 0, kind: input, shape index: {}]   ;;  %s8001_s1 = inlined_call_operand.vmem [shape: f32[16,128], index: 1, kind: input, shape index: {}]   ;;  %s8002_s2 = inlined_call_operand.vmem [shape: bf16[784,512], index: 2, kind: input, shape index: {}]   ;;  %s8003_s3 = inlined_call_operand.vmem [shape: f32[1,512], index: 3, kind: input, shape index: {}]   ;;  %s8004_s4 = inlined_call_operand.vmem [shape: bf16[512,128], index: 4, kind: input, shape index: {}]   ;;  %s8005_s5 = inlined_call_operand.vmem [shape: f32[1,128], index: 5, kind: input, shape index: {}]   ;;  %s8006_s6 = inlined_call_operand.vmem [shape: bf16[512,128], index: 6, kind: input, shape index: {}]   ;;  %s8007_s7 = inlined_call_operand.vmem [shape: f32[1,128], index: 7, kind: input, shape index: {}]   ;;  %s8008_s8 = inlined_call_operand.vmem [shape: bf16[128,512], index: 8, kind: input, shape index: {}]   ;;  %s8009_s9 = inlined_call_operand.vmem [shape: f32[1,512], index: 9, kind: input, shape index: {}]   ;;  %s8010_s10 = inlined_call_operand.vmem [shape: bf16[512,784], index: 10, kind: input, shape index: {}]   ;;  %s8011_s11 = inlined_call_operand.vmem [shape: f32[1,784], index: 11, kind: input, shape index: {}]   ;;  %s8012_s12 = inlined_call_operand.hbm [shape: bf16[16,784], index: 12, kind: output, shape index: {0}]   ;;  %s8013_s13 = inlined_call_operand.hbm [shape: f32[16,128], index: 13, kind: output, shape index: {1}]   ;;  %s8014_s14 = inlined_call_operand.hbm [shape: f32[16,128], index: 14, kind: output, shape index: {2}]  }
   0x1   :  { %v5344_v0 = vld [vmem:[%s8002_s2 + $0x4] ss:$16 sps:$4 sm:$0xff]   ;;  %v5346_v1 = vld [vmem:[%s8002_s2 + $0xc] ss:$16 sps:$4 sm:$0xff]   ;;  %v5348_v2 = vld [vmem:[%s8002_s2] ss:$16 sps:$4 sm:$0xff]  }
   0x2   :  { %1270 = vmatprep.subr.bf16.mxu0 %v5344_v0  ;;  %v5349_v3 = vld [vmem:[%s8002_s2 + $0x8] ss:$16 sps:$4 sm:$0xff]   ;;  %1442 = vmatprep.subr.bf16.mxu1 %v5346_v1  ;;  %v5350_v4 = vld [vmem:[%s8002_s2 + $0x24] ss:$16 sps:$4 sm:$0xff]   ;;  %v5352_v5 = vld [vmem:[%s8002_s2 + $0x2c] ss:$16 sps:$4 sm:$0xff]  }
   0x3   :  { %1271 = vmatpush1.bf16.msra.mxu0 %v5348_v2  ;;  %1443 = vmatpush1.bf16.msra.mxu1 %v5349_v3  ;;  %v5354_v6 = vld [vmem:[%s8002_s2 + $0x20] ss:$16 sps:$4 sm:$0xff]   ;;  %v5355_v7 = vld [vmem:[%s8002_s2 + $0x28] ss:$16 sps:$4 sm:$0xff]   ;;  %v5356_v8 = vld [vmem:[%s8002_s2 + $0x44] ss:$16 sps:$4 sm:$0xff]  }
   0x4   :  { %1272 = vmatprep.subr.bf16.mxu0 %v5350_v4  ;;  %1444 = vmatprep.subr.bf16.mxu1 %v5352_v5  ;;  %v5358_v9 = vld [vmem:[%s8002_s2 + $0x4c] ss:$16 sps:$4 sm:$0xff]   ;;  %v5360_v10 = vld [vmem:[%s8002_s2 + $0x40] ss:$16 sps:$4 sm:$0xff]   ;;  %v5361_v11 = vld [vmem:[%s8002_s2 + $0x48] ss:$16 sps:$4 sm:$0xff]  }
   0x5   :  { %v5362_v12 = vld [vmem:[%s8002_s2 + $0x64] ss:$16 sps:$4 sm:$0xff]   ;;  %v5364_v13 = vld [vmem:[%s8002_s2 + $0x6c] ss:$16 sps:$4 sm:$0xff]   ;;  %v5366_v14 = vld [vmem:[%s8002_s2 + $0x60] ss:$16 sps:$4 sm:$0xff]  }
   0x6   :  { %v5367_v15 = vld [vmem:[%s8002_s2 + $0x68] ss:$16 sps:$4 sm:$0xff]   ;;  %v5368_v16 = vld [vmem:[%s8002_s2 + $0x84] ss:$16 sps:$4 sm:$0xff]   ;;  %v5370_v17 = vld [vmem:[%s8002_s2 + $0x8c] ss:$16 sps:$4 sm:$0xff]  }
   0x7   :  { %1273 = vmatpush1.bf16.msra.mxu0 %v5354_v6  ;;  %1445 = vmatpush1.bf16.msra.mxu1 %v5355_v7  ;;  %v5372_v18 = vld [vmem:[%s8002_s2 + $0x80] ss:$16 sps:$4 sm:$0xff]   ;;  %v5373_v19 = vld [vmem:[%s8002_s2 + $0x88] ss:$16 sps:$4 sm:$0xff]   ;;  %v5374_v20 = vld [vmem:[%s8002_s2 + $0xa4] ss:$16 sps:$4 sm:$0xff]  }
   0x8   :  { %1274 = vmatprep.subr.bf16.mxu0 %v5356_v8  ;;  %1446 = vmatprep.subr.bf16.mxu1 %v5358_v9  ;;  %v5376_v21 = vld [vmem:[%s8002_s2 + $0xac] ss:$16 sps:$4 sm:$0xff]   ;;  %v5378_v22 = vld [vmem:[%s8002_s2 + $0xa0] ss:$16 sps:$4 sm:$0xff]   ;;  %v5379_v23 = vld [vmem:[%s8002_s2 + $0xa8] ss:$16 sps:$4 sm:$0xff]  }
   0x9   :  { %v5380_v24 = vld [vmem:[%s8002_s2 + $0xc4] ss:$16 sps:$4 sm:$0xff]   ;;  %v5382_v25 = vld [vmem:[%s8002_s2 + $0xcc] ss:$16 sps:$4 sm:$0xff]   ;;  %v5384_v26 = vld [vmem:[%s8002_s2 + $0xc0] ss:$16 sps:$4 sm:$0xff]  }
   0xa   :  { %v5385_v27 = vld [vmem:[%s8002_s2 + $0xc8] ss:$16 sps:$4 sm:$0xff]   ;;  %v5386_v28 = vld [vmem:[%s8002_s2 + $0xe4] ss:$16 sps:$4 sm:$0xff]   ;;  %v5388_v29 = vld [vmem:[%s8002_s2 + $0xec] ss:$16 sps:$4 sm:$0xff]  }
   0xb   :  { %1275 = vmatpush1.bf16.msra.mxu0 %v5360_v10  ;;  %1447 = vmatpush1.bf16.msra.mxu1 %v5361_v11  ;;  %v5390_v30 = vld [vmem:[%s8002_s2 + $0xe0] ss:$16 sps:$4 sm:$0xff]   ;;  %v5391_v31 = vld [vmem:[%s8002_s2 + $0xe8] ss:$16 sps:$4 sm:$0xff]   ;;  %v5392_v32 = vld [vmem:[%s8002_s2 + $0x104] ss:$16 sps:$4 sm:$0xff]  }
   0xc   :  { %1276 = vmatprep.subr.bf16.mxu0 %v5362_v12  ;;  %1448 = vmatprep.subr.bf16.mxu1 %v5364_v13  ;;  %v5394_v33 = vld [vmem:[%s8002_s2 + $0x10c] ss:$16 sps:$4 sm:$0xff]   ;;  %v5396_v34 = vld [vmem:[%s8002_s2 + $0x100] ss:$16 sps:$4 sm:$0xff]   ;;  %v5397_v35 = vld [vmem:[%s8002_s2 + $0x108] ss:$16 sps:$4 sm:$0xff]  }
   0xd   :  { %v5398_v36 = vld [vmem:[%s8002_s2 + $0x124] ss:$16 sps:$4 sm:$0xff]   ;;  %v5400_v37 = vld [vmem:[%s8002_s2 + $0x12c] ss:$16 sps:$4 sm:$0xff]   ;;  %v5402_v38 = vld [vmem:[%s8002_s2 + $0x120] ss:$16 sps:$4 sm:$0xff]  }
   0xe   :  { %v5403_v39 = vld [vmem:[%s8002_s2 + $0x128] ss:$16 sps:$4 sm:$0xff]   ;;  %v5404_v40 = vld [vmem:[%s8002_s2 + $0x144] ss:$16 sps:$4 sm:$0xff]   ;;  %v5406_v41 = vld [vmem:[%s8002_s2 + $0x14c] ss:$16 sps:$4 sm:$0xff]  }
   0xf   :  { %1277 = vmatpush1.bf16.msra.mxu0 %v5366_v14  ;;  %1449 = vmatpush1.bf16.msra.mxu1 %v5367_v15  ;;  %v5408_v42 = vld [vmem:[%s8002_s2 + $0x140] ss:$16 sps:$4 sm:$0xff]   ;;  %v5409_v43 = vld [vmem:[%s8002_s2 + $0x148] ss:$16 sps:$4 sm:$0xff]   ;;  %v5410_v44 = vld [vmem:[%s8002_s2 + $0x164] ss:$16 sps:$4 sm:$0xff]  }
  0x10   :  { %1278 = vmatprep.subr.bf16.mxu0 %v5368_v16  ;;  %1450 = vmatprep.subr.bf16.mxu1 %v5370_v17  ;;  %v5412_v45 = vld [vmem:[%s8002_s2 + $0x16c] ss:$16 sps:$4 sm:$0xff]   ;;  %v55_v47 = vld [vmem:[%s8000_s0 + $0x40] sm:$0xff]  ;;  %v5415_v49 = vld [vmem:[%s8002_s2 + $0x168] ss:$16 sps:$4 sm:$0xff]  }
  0x11   :  { %v48_v46 = vld [vmem:[%s8000_s0 + $0x8] sm:$0xff]  ;;  %v5414_v48 = vld [vmem:[%s8002_s2 + $0x160] ss:$16 sps:$4 sm:$0xff]   ;;  %v5416_v51 = vld [vmem:[%s8002_s2 + $0x184] ss:$16 sps:$4 sm:$0xff]  }
  0x12   :  { %v62_v50 = vpack.c.bf16 %v55_v47, %v48_v46  ;;  %v5418_v52 = vld [vmem:[%s8002_s2 + $0x18c] ss:$16 sps:$4 sm:$0xff]   ;;  %v5420_v53 = vld [vmem:[%s8002_s2 + $0x180] ss:$16 sps:$4 sm:$0xff]   ;;  %v5421_v54 = vld [vmem:[%s8002_s2 + $0x188] ss:$16 sps:$4 sm:$0xff]  }
  0x13   :  { %1279 = vmatpush1.bf16.msra.mxu0 %v5372_v18  ;;  %1451 = vmatpush1.bf16.msra.mxu1 %v5373_v19  ;;  %v5422_v55 = vld [vmem:[%s8002_s2 + $0x1a4] ss:$16 sps:$4 sm:$0xff]   ;;  %v5424_v56 = vld [vmem:[%s8002_s2 + $0x1ac] ss:$16 sps:$4 sm:$0xff]   ;;  %v5426_v57 = vld [vmem:[%s8002_s2 + $0x1a0] ss:$16 sps:$4 sm:$0xff]  }
  0x14   :  { %1280 = vmatprep.subr.bf16.mxu0 %v5374_v20  ;;  %1452 = vmatprep.subr.bf16.mxu1 %v5376_v21  ;;  %v5427_v58 = vld [vmem:[%s8002_s2 + $0x1a8] ss:$16 sps:$4 sm:$0xff]   ;;  %v5428_v59 = vld [vmem:[%s8002_s2 + $0x1c4] ss:$16 sps:$4 sm:$0xff]   ;;  %v5430_v60 = vld [vmem:[%s8002_s2 + $0x1cc] ss:$16 sps:$4 sm:$0xff]  }
  0x15   :  { %1302 = vmatprep.mubr.bf16.mxu0 %v62_v50  ;;  %1474 = vmatprep.mubr.bf16.mxu1 %v62_v50  ;;  %v5432_v61 = vld [vmem:[%s8002_s2 + $0x1c0] ss:$16 sps:$4 sm:$0xff]   ;;  %v5433_v62 = vld [vmem:[%s8002_s2 + $0x1c8] ss:$16 sps:$4 sm:$0xff]   ;;  %v5434_v63 = vld [vmem:[%s8002_s2 + $0x1e4] ss:$16 sps:$4 sm:$0xff]  }
  0x16   :  { %v5436_v0 = vld [vmem:[%s8002_s2 + $0x1ec] ss:$16 sps:$4 sm:$0xff]   ;;  %v5438_v1 = vld [vmem:[%s8002_s2 + $0x1e0] ss:$16 sps:$4 sm:$0xff]   ;;  %v5439_v2 = vld [vmem:[%s8002_s2 + $0x1e8] ss:$16 sps:$4 sm:$0xff]  }
  0x17   :  { %1281 = vmatpush1.bf16.msra.mxu0 %v5378_v22  ;;  %1453 = vmatpush1.bf16.msra.mxu1 %v5379_v23  ;;  %v5442_v3 = vld [vmem:[%s8002_s2 + $0x204] ss:$16 sps:$4 sm:$0xff]   ;;  %v54_v5 = vld [vmem:[%s8000_s0 + $0x38] sm:$0xff]  ;;  %v5440_v7 = vld [vmem:[%s8002_s2 + $0x200] ss:$16 sps:$4 sm:$0xff]  }
  0x18   :  { %1282 = vmatprep.subr.bf16.mxu0 %v5380_v24  ;;  %1454 = vmatprep.subr.bf16.mxu1 %v5382_v25  ;;  %v47_v4 = vld [vmem:[%s8000_s0] sm:$0xff]  ;;  %v5445_v6 = vld [vmem:[%s8002_s2 + $0x20c] ss:$16 sps:$4 sm:$0xff]   ;;  %v5443_v8 = vld [vmem:[%s8002_s2 + $0x208] ss:$16 sps:$4 sm:$0xff]  }
  0x19   :  { %v61_v9 = vpack.c.bf16 %v54_v5, %v47_v4  ;;  %v5448_v10 = vld [vmem:[%s8002_s2 + $0x224] ss:$16 sps:$4 sm:$0xff]   ;;  %v5451_v11 = vld [vmem:[%s8002_s2 + $0x22c] ss:$16 sps:$4 sm:$0xff]   ;;  %v5446_v12 = vld [vmem:[%s8002_s2 + $0x220] ss:$16 sps:$4 sm:$0xff]  }
  0x1a   :  { %v5449_v13 = vld [vmem:[%s8002_s2 + $0x228] ss:$16 sps:$4 sm:$0xff]   ;;  %v5454_v14 = vld [vmem:[%s8002_s2 + $0x244] ss:$16 sps:$4 sm:$0xff]   ;;  %v5457_v15 = vld [vmem:[%s8002_s2 + $0x24c] ss:$16 sps:$4 sm:$0xff]  }
  0x1b   :  { %1283 = vmatpush1.bf16.msra.mxu0 %v5384_v26  ;;  %1455 = vmatpush1.bf16.msra.mxu1 %v5385_v27  ;;  %v5452_v16 = vld [vmem:[%s8002_s2 + $0x240] ss:$16 sps:$4 sm:$0xff]   ;;  %v5455_v17 = vld [vmem:[%s8002_s2 + $0x248] ss:$16 sps:$4 sm:$0xff]   ;;  %v5460_v18 = vld [vmem:[%s8002_s2 + $0x264] ss:$16 sps:$4 sm:$0xff]  }
  0x1c   :  { %1284 = vmatprep.subr.bf16.mxu0 %v5386_v28  ;;  %1456 = vmatprep.subr.bf16.mxu1 %v5388_v29  ;;  %v5463_v19 = vld [vmem:[%s8002_s2 + $0x26c] ss:$16 sps:$4 sm:$0xff]   ;;  %v5458_v20 = vld [vmem:[%s8002_s2 + $0x260] ss:$16 sps:$4 sm:$0xff]   ;;  %v5461_v21 = vld [vmem:[%s8002_s2 + $0x268] ss:$16 sps:$4 sm:$0xff]  }
  0x1d   :  { %v5466_v22 = vld [vmem:[%s8002_s2 + $0x284] ss:$16 sps:$4 sm:$0xff]   ;;  %v5469_v23 = vld [vmem:[%s8002_s2 + $0x28c] ss:$16 sps:$4 sm:$0xff]   ;;  %v5464_v24 = vld [vmem:[%s8002_s2 + $0x280] ss:$16 sps:$4 sm:$0xff]  }
  0x1e   :  { %v5467_v25 = vld [vmem:[%s8002_s2 + $0x288] ss:$16 sps:$4 sm:$0xff]   ;;  %v5472_v26 = vld [vmem:[%s8002_s2 + $0x2a4] ss:$16 sps:$4 sm:$0xff]   ;;  %v5475_v27 = vld [vmem:[%s8002_s2 + $0x2ac] ss:$16 sps:$4 sm:$0xff]  }
  0x1f   :  { %1285 = vmatpush1.bf16.msra.mxu0 %v5390_v30  ;;  %1457 = vmatpush1.bf16.msra.mxu1 %v5391_v31  ;;  %v5470_v28 = vld [vmem:[%s8002_s2 + $0x2a0] ss:$16 sps:$4 sm:$0xff]   ;;  %v5473_v29 = vld [vmem:[%s8002_s2 + $0x2a8] ss:$16 sps:$4 sm:$0xff]   ;;  %v5478_v30 = vld [vmem:[%s8002_s2 + $0x2c4] ss:$16 sps:$4 sm:$0xff]  }
  0x20   :  { %1286 = vmatprep.subr.bf16.mxu0 %v5392_v32  ;;  %1458 = vmatprep.subr.bf16.mxu1 %v5394_v33  ;;  %v5481_v31 = vld [vmem:[%s8002_s2 + $0x2cc] ss:$16 sps:$4 sm:$0xff]   ;;  %v57_v33 = vld [vmem:[%s8000_s0 + $0x50] sm:$0xff]  ;;  %v5527_v4 = vld [vmem:[%s8002_s2 + $0x3c8] ss:$16 sps:$4 sm:$0xff]  }
  0x21   :  { %v50_v32 = vld [vmem:[%s8000_s0 + $0x18] sm:$0xff]  ;;  %v5494_v47 = vld [vmem:[%s8002_s2 + $0x320] ss:$16 sps:$4 sm:$0xff]   ;;  %v5532_v5 = vld [vmem:[%s8002_s2 + $0x3e4] ss:$16 sps:$4 sm:$0xff]  }
  0x22   :  { %v5499_v46 = vld [vmem:[%s8002_s2 + $0x32c] ss:$16 sps:$4 sm:$0xff]  }
  0x23   :  { %1287 = vmatpush1.bf16.msra.mxu0 %v5396_v34  ;;  %1459 = vmatpush1.bf16.msra.mxu1 %v5397_v35  ;;  %v5476_v34 = vld [vmem:[%s8002_s2 + $0x2c0] ss:$16 sps:$4 sm:$0xff]   ;;  %v5479_v35 = vld [vmem:[%s8002_s2 + $0x2c8] ss:$16 sps:$4 sm:$0xff]   ;;  %v5505_v50 = vld [vmem:[%s8002_s2 + $0x34c] ss:$16 sps:$4 sm:$0xff]  }
  0x24   :  { %1288 = vmatprep.subr.bf16.mxu0 %v5398_v36  ;;  %1460 = vmatprep.subr.bf16.mxu1 %v5400_v37  ;;  %v64_v36 = vpack.c.bf16 %v57_v33, %v50_v32  ;;  %v5484_v37 = vld [vmem:[%s8002_s2 + $0x2e4] ss:$16 sps:$4 sm:$0xff]   ;;  %v5565_v32 = vld [vmem:[%s8002_s2 + $0x48c] ss:$16 sps:$4 sm:$0xff]   ;;  %v5560_v33 = vld [vmem:[%s8002_s2 + $0x480] ss:$16 sps:$4 sm:$0xff]  }
  0x27   :  { %1289 = vmatpush1.bf16.msra.mxu0 %v5402_v38  ;;  %1461 = vmatpush1.bf16.msra.mxu1 %v5403_v39  ;;  %v5487_v38 = vld [vmem:[%s8002_s2 + $0x2ec] ss:$16 sps:$4 sm:$0xff]   ;;  %v5482_v39 = vld [vmem:[%s8002_s2 + $0x2e0] ss:$16 sps:$4 sm:$0xff]  }
  0x28   :  { %1290 = vmatprep.subr.bf16.mxu0 %v5404_v40  ;;  %1462 = vmatprep.subr.bf16.mxu1 %v5406_v41  ;;  %v5485_v40 = vld [vmem:[%s8002_s2 + $0x2e8] ss:$16 sps:$4 sm:$0xff]   ;;  %v5490_v41 = vld [vmem:[%s8002_s2 + $0x304] ss:$16 sps:$4 sm:$0xff]  }
  0x2b   :  { %1291 = vmatpush1.bf16.msra.mxu0 %v5408_v42  ;;  %1463 = vmatpush1.bf16.msra.mxu1 %v5409_v43  ;;  %v5493_v42 = vld [vmem:[%s8002_s2 + $0x30c] ss:$16 sps:$4 sm:$0xff]   ;;  %v5488_v43 = vld [vmem:[%s8002_s2 + $0x300] ss:$16 sps:$4 sm:$0xff]  }
  0x2c   :  { %1292 = vmatprep.subr.bf16.mxu0 %v5410_v44  ;;  %1464 = vmatprep.subr.bf16.mxu1 %v5412_v45  ;;  %v5491_v44 = vld [vmem:[%s8002_s2 + $0x308] ss:$16 sps:$4 sm:$0xff]   ;;  %v5496_v45 = vld [vmem:[%s8002_s2 + $0x324] ss:$16 sps:$4 sm:$0xff]  }
  0x2f   :  { %1293 = vmatpush1.bf16.msra.mxu0 %v5414_v48  ;;  %1465 = vmatpush1.bf16.msra.mxu1 %v5415_v49  ;;  %v5497_v48 = vld [vmem:[%s8002_s2 + $0x328] ss:$16 sps:$4 sm:$0xff]   ;;  %v5502_v49 = vld [vmem:[%s8002_s2 + $0x344] ss:$16 sps:$4 sm:$0xff]  }
  0x30   :  { %1294 = vmatprep.subr.bf16.mxu0 %v5416_v51  ;;  %1466 = vmatprep.subr.bf16.mxu1 %v5418_v52  ;;  %v5500_v51 = vld [vmem:[%s8002_s2 + $0x340] ss:$16 sps:$4 sm:$0xff]   ;;  %v5503_v52 = vld [vmem:[%s8002_s2 + $0x348] ss:$16 sps:$4 sm:$0xff]  }
  0x33   :  { %1295 = vmatpush1.bf16.msra.mxu0 %v5420_v53  ;;  %1467 = vmatpush1.bf16.msra.mxu1 %v5421_v54  ;;  %v5508_v53 = vld [vmem:[%s8002_s2 + $0x364] ss:$16 sps:$4 sm:$0xff]   ;;  %v5511_v54 = vld [vmem:[%s8002_s2 + $0x36c] ss:$16 sps:$4 sm:$0xff]  }
  0x34   :  { %1296 = vmatprep.subr.bf16.mxu0 %v5422_v55  ;;  %1468 = vmatprep.subr.bf16.mxu1 %v5424_v56  ;;  %v5506_v55 = vld [vmem:[%s8002_s2 + $0x360] ss:$16 sps:$4 sm:$0xff]   ;;  %v5509_v56 = vld [vmem:[%s8002_s2 + $0x368] ss:$16 sps:$4 sm:$0xff]  }
  0x37   :  { %1297 = vmatpush1.bf16.msra.mxu0 %v5426_v57  ;;  %1469 = vmatpush1.bf16.msra.mxu1 %v5427_v58  ;;  %v5514_v57 = vld [vmem:[%s8002_s2 + $0x384] ss:$16 sps:$4 sm:$0xff]   ;;  %v5517_v58 = vld [vmem:[%s8002_s2 + $0x38c] ss:$16 sps:$4 sm:$0xff]  }
  0x38   :  { %1298 = vmatprep.subr.bf16.mxu0 %v5428_v59  ;;  %1470 = vmatprep.subr.bf16.mxu1 %v5430_v60  ;;  %v5512_v59 = vld [vmem:[%s8002_s2 + $0x380] ss:$16 sps:$4 sm:$0xff]   ;;  %v5515_v60 = vld [vmem:[%s8002_s2 + $0x388] ss:$16 sps:$4 sm:$0xff]  }
  0x3b   :  { %1299 = vmatpush1.bf16.msra.mxu0 %v5432_v61  ;;  %1471 = vmatpush1.bf16.msra.mxu1 %v5433_v62  ;;  %v5520_v61 = vld [vmem:[%s8002_s2 + $0x3a4] ss:$16 sps:$4 sm:$0xff]   ;;  %v5523_v62 = vld [vmem:[%s8002_s2 + $0x3ac] ss:$16 sps:$4 sm:$0xff]  }
  0x3c   :  { %1300 = vmatprep.subr.bf16.mxu0 %v5434_v63  ;;  %1472 = vmatprep.subr.bf16.mxu1 %v5436_v0  ;;  %v5518_v63 = vld [vmem:[%s8002_s2 + $0x3a0] ss:$16 sps:$4 sm:$0xff]   ;;  %v5521_v0 = vld [vmem:[%s8002_s2 + $0x3a8] ss:$16 sps:$4 sm:$0xff]  }
  0x3f   :  { %1301 = vmatpush1.bf16.msra.mxu0 %v5438_v1  ;;  %1473 = vmatpush1.bf16.msra.mxu1 %v5439_v2  ;;  %v5526_v1 = vld [vmem:[%s8002_s2 + $0x3c4] ss:$16 sps:$4 sm:$0xff]   ;;  %v5529_v2 = vld [vmem:[%s8002_s2 + $0x3cc] ss:$16 sps:$4 sm:$0xff]  }
  0x40   :  { %1313 = vmatprep.subr.bf16.mxu0 %v5442_v3  ;;  %1485 = vmatprep.subr.bf16.mxu1 %v5445_v6  ;;  %v5524_v3 = vld [vmem:[%s8002_s2 + $0x3c0] ss:$16 sps:$4 sm:$0xff]   ;;  %v5535_v6 = vld [vmem:[%s8002_s2 + $0x3ec] ss:$16 sps:$4 sm:$0xff]  }
  0x42   :  { %1303 = vmatmul.mubr.bf16.vlgmr.msra.gmra.mrb[0].mxu0 %v61_v9  ;;  %1475 = vmatmul.mubr.bf16.vlgmr.msra.gmra.mrb[0].mxu1 %v61_v9  ;;  %v5538_v9 = vld [vmem:[%s8002_s2 + $0x404] ss:$16 sps:$4 sm:$0xff]  }
  0x43   :  { %1314 = vmatpush1.bf16.msra.mxu0 %v5440_v7  ;;  %1486 = vmatpush1.bf16.msra.mxu1 %v5443_v8  ;;  %v5530_v7 = vld [vmem:[%s8002_s2 + $0x3e0] ss:$16 sps:$4 sm:$0xff]   ;;  %v5533_v8 = vld [vmem:[%s8002_s2 + $0x3e8] ss:$16 sps:$4 sm:$0xff]  }
  0x44   :  { %1315 = vmatprep.subr.bf16.mxu0 %v5448_v10  ;;  %1487 = vmatprep.subr.bf16.mxu1 %v5451_v11  ;;  %v49_v10 = vld [vmem:[%s8000_s0 + $0x10] sm:$0xff]  ;;  %v56_v11 = vld [vmem:[%s8000_s0 + $0x48] sm:$0xff] }
  0x45   :  { %1345 = vmatprep.mubr.bf16.mxu0 %v64_v36  ;;  %1517 = vmatprep.mubr.bf16.mxu1 %v64_v36  ;;  %v5571_v36 = vld [vmem:[%s8002_s2 + $0x4ac] ss:$16 sps:$4 sm:$0xff]  }
  0x47   :  { %1316 = vmatpush1.bf16.msra.mxu0 %v5446_v12  ;;  %1488 = vmatpush1.bf16.msra.mxu1 %v5449_v13  ;;  %v5541_v12 = vld [vmem:[%s8002_s2 + $0x40c] ss:$16 sps:$4 sm:$0xff]   ;;  %v5536_v13 = vld [vmem:[%s8002_s2 + $0x400] ss:$16 sps:$4 sm:$0xff]  }
  0x48   :  { %1317 = vmatprep.subr.bf16.mxu0 %v5454_v14  ;;  %1489 = vmatprep.subr.bf16.mxu1 %v5457_v15  ;;  %v5539_v14 = vld [vmem:[%s8002_s2 + $0x408] ss:$16 sps:$4 sm:$0xff]   ;;  %v63_v15 = vpack.c.bf16 %v56_v11, %v49_v10  ;;  %v5628_v11 = vld [vmem:[%s8002_s2 + $0x5e4] ss:$16 sps:$4 sm:$0xff]  }
  0x49   :  { %v5623_v10 = vld [vmem:[%s8002_s2 + $0x5c8] ss:$16 sps:$4 sm:$0xff]  }
  0x4b   :  { %1318 = vmatpush1.bf16.msra.mxu0 %v5452_v16  ;;  %1490 = vmatpush1.bf16.msra.mxu1 %v5455_v17  ;;  %v5544_v16 = vld [vmem:[%s8002_s2 + $0x424] ss:$16 sps:$4 sm:$0xff]   ;;  %v5547_v17 = vld [vmem:[%s8002_s2 + $0x42c] ss:$16 sps:$4 sm:$0xff]  }
  0x4c   :  { %1319 = vmatprep.subr.bf16.mxu0 %v5460_v18  ;;  %1491 = vmatprep.subr.bf16.mxu1 %v5463_v19  ;;  %v52_v18 = vld [vmem:[%s8000_s0 + $0x28] sm:$0xff]  ;;  %v5542_v19 = vld [vmem:[%s8002_s2 + $0x420] ss:$16 sps:$4 sm:$0xff]  }
  0x4f   :  { %1320 = vmatpush1.bf16.msra.mxu0 %v5458_v20  ;;  %1492 = vmatpush1.bf16.msra.mxu1 %v5461_v21  ;;  %v5545_v20 = vld [vmem:[%s8002_s2 + $0x428] ss:$16 sps:$4 sm:$0xff]   ;;  %v59_v21 = vld [vmem:[%s8000_s0 + $0x60] sm:$0xff] }
  0x50   :  { %1321 = vmatprep.subr.bf16.mxu0 %v5466_v22  ;;  %1493 = vmatprep.subr.bf16.mxu1 %v5469_v23  ;;  %v5550_v22 = vld [vmem:[%s8002_s2 + $0x444] ss:$16 sps:$4 sm:$0xff]   ;;  %v66_v23 = vpack.c.bf16 %v59_v21, %v52_v18  ;;  %v5637_v18 = vld [vmem:[%s8002_s2 + $0x60c] ss:$16 sps:$4 sm:$0xff]  }
  0x53   :  { %1322 = vmatpush1.bf16.msra.mxu0 %v5464_v24  ;;  %1494 = vmatpush1.bf16.msra.mxu1 %v5467_v25  ;;  %v5553_v24 = vld [vmem:[%s8002_s2 + $0x44c] ss:$16 sps:$4 sm:$0xff]   ;;  %v5548_v25 = vld [vmem:[%s8002_s2 + $0x440] ss:$16 sps:$4 sm:$0xff]  }
  0x54   :  { %1323 = vmatprep.subr.bf16.mxu0 %v5472_v26  ;;  %1495 = vmatprep.subr.bf16.mxu1 %v5475_v27  ;;  %v5551_v26 = vld [vmem:[%s8002_s2 + $0x448] ss:$16 sps:$4 sm:$0xff]   ;;  %v5556_v27 = vld [vmem:[%s8002_s2 + $0x464] ss:$16 sps:$4 sm:$0xff]  }
  0x57   :  { %1324 = vmatpush1.bf16.msra.mxu0 %v5470_v28  ;;  %1496 = vmatpush1.bf16.msra.mxu1 %v5473_v29  ;;  %v5559_v28 = vld [vmem:[%s8002_s2 + $0x46c] ss:$16 sps:$4 sm:$0xff]   ;;  %v5554_v29 = vld [vmem:[%s8002_s2 + $0x460] ss:$16 sps:$4 sm:$0xff]  }
  0x58   :  { %1325 = vmatprep.subr.bf16.mxu0 %v5478_v30  ;;  %1497 = vmatprep.subr.bf16.mxu1 %v5481_v31  ;;  %v5557_v30 = vld [vmem:[%s8002_s2 + $0x468] ss:$16 sps:$4 sm:$0xff]   ;;  %v5562_v31 = vld [vmem:[%s8002_s2 + $0x484] ss:$16 sps:$4 sm:$0xff]  }
  0x5b   :  { %1326 = vmatpush1.bf16.msra.mxu0 %v5476_v34  ;;  %1498 = vmatpush1.bf16.msra.mxu1 %v5479_v35  ;;  %v5563_v34 = vld [vmem:[%s8002_s2 + $0x488] ss:$16 sps:$4 sm:$0xff]   ;;  %v5568_v35 = vld [vmem:[%s8002_s2 + $0x4a4] ss:$16 sps:$4 sm:$0xff]  }
  0x5c   :  { %1327 = vmatprep.subr.bf16.mxu0 %v5484_v37  ;;  %1499 = vmatprep.subr.bf16.mxu1 %v5487_v38  ;;  %v5566_v37 = vld [vmem:[%s8002_s2 + $0x4a0] ss:$16 sps:$4 sm:$0xff]   ;;  %v5569_v38 = vld [vmem:[%s8002_s2 + $0x4a8] ss:$16 sps:$4 sm:$0xff]  }
  0x5f   :  { %1328 = vmatpush1.bf16.msra.mxu0 %v5482_v39  ;;  %1500 = vmatpush1.bf16.msra.mxu1 %v5485_v40  ;;  %v5574_v39 = vld [vmem:[%s8002_s2 + $0x4c4] ss:$16 sps:$4 sm:$0xff]   ;;  %v5577_v40 = vld [vmem:[%s8002_s2 + $0x4cc] ss:$16 sps:$4 sm:$0xff]  }
  0x60   :  { %1329 = vmatprep.subr.bf16.mxu0 %v5490_v41  ;;  %1501 = vmatprep.subr.bf16.mxu1 %v5493_v42  ;;  %v5572_v41 = vld [vmem:[%s8002_s2 + $0x4c0] ss:$16 sps:$4 sm:$0xff]   ;;  %v5575_v42 = vld [vmem:[%s8002_s2 + $0x4c8] ss:$16 sps:$4 sm:$0xff]  }
  0x63   :  { %1330 = vmatpush1.bf16.msra.mxu0 %v5488_v43  ;;  %1502 = vmatpush1.bf16.msra.mxu1 %v5491_v44  ;;  %v5580_v43 = vld [vmem:[%s8002_s2 + $0x4e4] ss:$16 sps:$4 sm:$0xff]   ;;  %v5583_v44 = vld [vmem:[%s8002_s2 + $0x4ec] ss:$16 sps:$4 sm:$0xff]  }
  0x64   :  { %1331 = vmatprep.subr.bf16.mxu0 %v5496_v45  ;;  %1503 = vmatprep.subr.bf16.mxu1 %v5499_v46  ;;  %v5578_v45 = vld [vmem:[%s8002_s2 + $0x4e0] ss:$16 sps:$4 sm:$0xff]   ;;  %v5581_v46 = vld [vmem:[%s8002_s2 + $0x4e8] ss:$16 sps:$4 sm:$0xff]  }
  0x67   :  { %1332 = vmatpush1.bf16.msra.mxu0 %v5494_v47  ;;  %1504 = vmatpush1.bf16.msra.mxu1 %v5497_v48  ;;  %v5586_v47 = vld [vmem:[%s8002_s2 + $0x504] ss:$16 sps:$4 sm:$0xff]   ;;  %v5589_v48 = vld [vmem:[%s8002_s2 + $0x50c] ss:$16 sps:$4 sm:$0xff]  }
  0x68   :  { %1333 = vmatprep.subr.bf16.mxu0 %v5502_v49  ;;  %1505 = vmatprep.subr.bf16.mxu1 %v5505_v50  ;;  %v5584_v49 = vld [vmem:[%s8002_s2 + $0x500] ss:$16 sps:$4 sm:$0xff]   ;;  %v5587_v50 = vld [vmem:[%s8002_s2 + $0x508] ss:$16 sps:$4 sm:$0xff]  }
  0x6b   :  { %1334 = vmatpush1.bf16.msra.mxu0 %v5500_v51  ;;  %1506 = vmatpush1.bf16.msra.mxu1 %v5503_v52  ;;  %v5592_v51 = vld [vmem:[%s8002_s2 + $0x524] ss:$16 sps:$4 sm:$0xff]   ;;  %v5595_v52 = vld [vmem:[%s8002_s2 + $0x52c] ss:$16 sps:$4 sm:$0xff]  }
  0x6c   :  { %1335 = vmatprep.subr.bf16.mxu0 %v5508_v53  ;;  %1507 = vmatprep.subr.bf16.mxu1 %v5511_v54  ;;  %v5590_v53 = vld [vmem:[%s8002_s2 + $0x520] ss:$16 sps:$4 sm:$0xff]   ;;  %v5593_v54 = vld [vmem:[%s8002_s2 + $0x528] ss:$16 sps:$4 sm:$0xff]  }
  0x6f   :  { %1336 = vmatpush1.bf16.msra.mxu0 %v5506_v55  ;;  %1508 = vmatpush1.bf16.msra.mxu1 %v5509_v56  ;;  %v5598_v55 = vld [vmem:[%s8002_s2 + $0x544] ss:$16 sps:$4 sm:$0xff]   ;;  %v5601_v56 = vld [vmem:[%s8002_s2 + $0x54c] ss:$16 sps:$4 sm:$0xff]  }
  0x70   :  { %1337 = vmatprep.subr.bf16.mxu0 %v5514_v57  ;;  %1509 = vmatprep.subr.bf16.mxu1 %v5517_v58  ;;  %v5596_v57 = vld [vmem:[%s8002_s2 + $0x540] ss:$16 sps:$4 sm:$0xff]   ;;  %v5599_v58 = vld [vmem:[%s8002_s2 + $0x548] ss:$16 sps:$4 sm:$0xff]  }
  0x73   :  { %1338 = vmatpush1.bf16.msra.mxu0 %v5512_v59  ;;  %1510 = vmatpush1.bf16.msra.mxu1 %v5515_v60  ;;  %v5604_v59 = vld [vmem:[%s8002_s2 + $0x564] ss:$16 sps:$4 sm:$0xff]   ;;  %v5607_v60 = vld [vmem:[%s8002_s2 + $0x56c] ss:$16 sps:$4 sm:$0xff]  }
  0x74   :  { %1339 = vmatprep.subr.bf16.mxu0 %v5520_v61  ;;  %1511 = vmatprep.subr.bf16.mxu1 %v5523_v62  ;;  %v5602_v61 = vld [vmem:[%s8002_s2 + $0x560] ss:$16 sps:$4 sm:$0xff]   ;;  %v5605_v62 = vld [vmem:[%s8002_s2 + $0x568] ss:$16 sps:$4 sm:$0xff]  }
  0x77   :  { %1340 = vmatpush1.bf16.msra.mxu0 %v5518_v63  ;;  %1512 = vmatpush1.bf16.msra.mxu1 %v5521_v0  ;;  %v5610_v63 = vld [vmem:[%s8002_s2 + $0x584] ss:$16 sps:$4 sm:$0xff]   ;;  %v5613_v0 = vld [vmem:[%s8002_s2 + $0x58c] ss:$16 sps:$4 sm:$0xff]  }
  0x78   :  { %1341 = vmatprep.subr.bf16.mxu0 %v5526_v1  ;;  %1513 = vmatprep.subr.bf16.mxu1 %v5529_v2  ;;  %v5608_v1 = vld [vmem:[%s8002_s2 + $0x580] ss:$16 sps:$4 sm:$0xff]   ;;  %v5611_v2 = vld [vmem:[%s8002_s2 + $0x588] ss:$16 sps:$4 sm:$0xff]  }
  0x7b   :  { %1342 = vmatpush1.bf16.msra.mxu0 %v5524_v3  ;;  %1514 = vmatpush1.bf16.msra.mxu1 %v5527_v4  ;;  %v5616_v3 = vld [vmem:[%s8002_s2 + $0x5a4] ss:$16 sps:$4 sm:$0xff]   ;;  %v5619_v4 = vld [vmem:[%s8002_s2 + $0x5ac] ss:$16 sps:$4 sm:$0xff]  }
  0x7c   :  { %1343 = vmatprep.subr.bf16.mxu0 %v5532_v5  ;;  %1515 = vmatprep.subr.bf16.mxu1 %v5535_v6  ;;  %v5614_v5 = vld [vmem:[%s8002_s2 + $0x5a0] ss:$16 sps:$4 sm:$0xff]   ;;  %v5617_v6 = vld [vmem:[%s8002_s2 + $0x5a8] ss:$16 sps:$4 sm:$0xff]  }
  0x7f   :  { %1344 = vmatpush1.bf16.msra.mxu0 %v5530_v7  ;;  %1516 = vmatpush1.bf16.msra.mxu1 %v5533_v8  ;;  %v5622_v7 = vld [vmem:[%s8002_s2 + $0x5c4] ss:$16 sps:$4 sm:$0xff]   ;;  %v5625_v8 = vld [vmem:[%s8002_s2 + $0x5cc] ss:$16 sps:$4 sm:$0xff]  }
  0x80   :  { %1356 = vmatprep.subr.bf16.mxu0 %v5538_v9  ;;  %1528 = vmatprep.subr.bf16.mxu1 %v5541_v12  ;;  %v5620_v9 = vld [vmem:[%s8002_s2 + $0x5c0] ss:$16 sps:$4 sm:$0xff]   ;;  %v5631_v12 = vld [vmem:[%s8002_s2 + $0x5ec] ss:$16 sps:$4 sm:$0xff]  }
  0x82   :  { %1346 = vmatmul.mubr.bf16.vlgmr.msra.gmra.mrb[0].mxu0 %v63_v15  ;;  %1518 = vmatmul.mubr.bf16.vlgmr.msra.gmra.mrb[0].mxu1 %v63_v15  ;;  %v51_v15 = vld [vmem:[%s8000_s0 + $0x20] sm:$0xff] }
  0x83   :  { %1357 = vmatpush1.bf16.msra.mxu0 %v5536_v13  ;;  %1529 = vmatpush1.bf16.msra.mxu1 %v5539_v14  ;;  %v5626_v13 = vld [vmem:[%s8002_s2 + $0x5e0] ss:$16 sps:$4 sm:$0xff]   ;;  %v5629_v14 = vld [vmem:[%s8002_s2 + $0x5e8] ss:$16 sps:$4 sm:$0xff]  }
  0x84   :  { %1358 = vmatprep.subr.bf16.mxu0 %v5544_v16  ;;  %1530 = vmatprep.subr.bf16.mxu1 %v5547_v17  ;;  %v58_v16 = vld [vmem:[%s8000_s0 + $0x58] sm:$0xff]  ;;  %v5634_v17 = vld [vmem:[%s8002_s2 + $0x604] ss:$16 sps:$4 sm:$0xff]  }
  0x85   :  { %1388 = vmatprep.mubr.bf16.mxu0 %v66_v23  ;;  %1560 = vmatprep.mubr.bf16.mxu1 %v66_v23  ;;  %v65_v21 = vpack.c.bf16 %v58_v16, %v51_v15  ;;  %v5640_v23 = vld [vmem:[%s8006_s6 + $0x40] sm:$0xff]  }
  0x87   :  { %1359 = vmatpush1.bf16.msra.mxu0 %v5542_v19  ;;  %1531 = vmatpush1.bf16.msra.mxu1 %v5545_v20  ;;  %v5632_v19 = vld [vmem:[%s8002_s2 + $0x600] ss:$16 sps:$4 sm:$0xff]   ;;  %v5635_v20 = vld [vmem:[%s8002_s2 + $0x608] ss:$16 sps:$4 sm:$0xff]  }
  0x88   :  { %1360 = vmatprep.subr.bf16.mxu0 %v5550_v22  ;;  %1532 = vmatprep.subr.bf16.mxu1 %v5553_v24  ;;  %v5638_v22 = vld [vmem:[%s8004_s4 + $0x40] sm:$0xff]   ;;  %v6200_v24 = vmov 0  }
  0x8b   :  { %1361 = vmatpush1.bf16.msra.mxu0 %v5548_v25  ;;  %1533 = vmatpush1.bf16.msra.mxu1 %v5551_v26  ;;  %v53_v25 = vld [vmem:[%s8000_s0 + $0x30] sm:$0xff]  ;;  %v60_v26 = vld [vmem:[%s8000_s0 + $0x68] sm:$0xff] }
  0x8c   :  { %1362 = vmatprep.subr.bf16.mxu0 %v5556_v27  ;;  %1534 = vmatprep.subr.bf16.mxu1 %v5559_v28  ;;  %v5639_v27 = vld [vmem:[%s8004_s4] sm:$0xff]  }
  0x8d   :  { %v5641_v28 = vld [vmem:[%s8006_s6] sm:$0xff]  }
  0x8f   :  { %1363 = vmatpush1.bf16.msra.mxu0 %v5554_v29  ;;  %1535 = vmatpush1.bf16.msra.mxu1 %v5557_v30  ;;  %v67_v29 = vpack.c.bf16 %v60_v26, %v53_v25  ;;  %v5642_v30 = vld [vmem:[%s8004_s4 + $0x48] sm:$0xff]  }
  0x90   :  { %1364 = vmatprep.subr.bf16.mxu0 %v5562_v31  ;;  %1536 = vmatprep.subr.bf16.mxu1 %v5565_v32  ;;  %v5644_v31 = vld [vmem:[%s8006_s6 + $0x48] sm:$0xff]  }
  0x91   :  { %v5643_v32 = vld [vmem:[%s8004_s4 + $0x8] sm:$0xff]  }
  0x93   :  { %1365 = vmatpush1.bf16.msra.mxu0 %v5560_v33  ;;  %1537 = vmatpush1.bf16.msra.mxu1 %v5563_v34  ;;  %v5645_v33 = vld [vmem:[%s8006_s6 + $0x8] sm:$0xff]   ;;  %v5646_v34 = vld [vmem:[%s8004_s4 + $0x50] sm:$0xff]  }
  0x94   :  { %1366 = vmatprep.subr.bf16.mxu0 %v5568_v35  ;;  %1538 = vmatprep.subr.bf16.mxu1 %v5571_v36  ;;  %v5648_v35 = vld [vmem:[%s8006_s6 + $0x50] sm:$0xff]  }
  0x95   :  { %v5647_v36 = vld [vmem:[%s8004_s4 + $0x10] sm:$0xff]  }
  0x97   :  { %1367 = vmatpush1.bf16.msra.mxu0 %v5566_v37  ;;  %1539 = vmatpush1.bf16.msra.mxu1 %v5569_v38  ;;  %v5649_v37 = vld [vmem:[%s8006_s6 + $0x10] sm:$0xff]   ;;  %v5650_v38 = vld [vmem:[%s8004_s4 + $0x58] sm:$0xff]  }
  0x98   :  { %1368 = vmatprep.subr.bf16.mxu0 %v5574_v39  ;;  %1540 = vmatprep.subr.bf16.mxu1 %v5577_v40  ;;  %v5652_v39 = vld [vmem:[%s8006_s6 + $0x58] sm:$0xff]  }
  0x99   :  { %v5651_v40 = vld [vmem:[%s8004_s4 + $0x18] sm:$0xff]  }
  0x9b   :  { %1369 = vmatpush1.bf16.msra.mxu0 %v5572_v41  ;;  %1541 = vmatpush1.bf16.msra.mxu1 %v5575_v42  ;;  %v5653_v41 = vld [vmem:[%s8006_s6 + $0x18] sm:$0xff]   ;;  %v5654_v42 = vld [vmem:[%s8004_s4 + $0x60] sm:$0xff]  }
  0x9c   :  { %1370 = vmatprep.subr.bf16.mxu0 %v5580_v43  ;;  %1542 = vmatprep.subr.bf16.mxu1 %v5583_v44  ;;  %v5656_v43 = vld [vmem:[%s8006_s6 + $0x60] sm:$0xff]  }
  0x9d   :  { %v5655_v44 = vld [vmem:[%s8004_s4 + $0x20] sm:$0xff]  }
  0x9f   :  { %1371 = vmatpush1.bf16.msra.mxu0 %v5578_v45  ;;  %1543 = vmatpush1.bf16.msra.mxu1 %v5581_v46  ;;  %v5657_v45 = vld [vmem:[%s8006_s6 + $0x20] sm:$0xff]   ;;  %v5658_v46 = vld [vmem:[%s8004_s4 + $0x68] sm:$0xff]  }
  0xa0   :  { %1372 = vmatprep.subr.bf16.mxu0 %v5586_v47  ;;  %1544 = vmatprep.subr.bf16.mxu1 %v5589_v48  ;;  %v5660_v47 = vld [vmem:[%s8006_s6 + $0x68] sm:$0xff]  }
  0xa1   :  { %v5659_v48 = vld [vmem:[%s8004_s4 + $0x28] sm:$0xff]  }
  0xa3   :  { %1373 = vmatpush1.bf16.msra.mxu0 %v5584_v49  ;;  %1545 = vmatpush1.bf16.msra.mxu1 %v5587_v50 }
  0xa4   :  { %1374 = vmatprep.subr.bf16.mxu0 %v5592_v51  ;;  %1546 = vmatprep.subr.bf16.mxu1 %v5595_v52 }
  0xa7   :  { %1375 = vmatpush1.bf16.msra.mxu0 %v5590_v53  ;;  %1547 = vmatpush1.bf16.msra.mxu1 %v5593_v54 }
  0xa8   :  { %1376 = vmatprep.subr.bf16.mxu0 %v5598_v55  ;;  %1548 = vmatprep.subr.bf16.mxu1 %v5601_v56 }
  0xab   :  { %1377 = vmatpush1.bf16.msra.mxu0 %v5596_v57  ;;  %1549 = vmatpush1.bf16.msra.mxu1 %v5599_v58 }
  0xac   :  { %1378 = vmatprep.subr.bf16.mxu0 %v5604_v59  ;;  %1550 = vmatprep.subr.bf16.mxu1 %v5607_v60 }
  0xaf   :  { %1379 = vmatpush1.bf16.msra.mxu0 %v5602_v61  ;;  %1551 = vmatpush1.bf16.msra.mxu1 %v5605_v62 }
  0xb0   :  { %1380 = vmatprep.subr.bf16.mxu0 %v5610_v63  ;;  %1552 = vmatprep.subr.bf16.mxu1 %v5613_v0 }
  0xb3   :  { %1381 = vmatpush1.bf16.msra.mxu0 %v5608_v1  ;;  %1553 = vmatpush1.bf16.msra.mxu1 %v5611_v2 }
  0xb4   :  { %1382 = vmatprep.subr.bf16.mxu0 %v5616_v3  ;;  %1554 = vmatprep.subr.bf16.mxu1 %v5619_v4 }
  0xb7   :  { %1383 = vmatpush1.bf16.msra.mxu0 %v5614_v5  ;;  %1555 = vmatpush1.bf16.msra.mxu1 %v5617_v6 }
  0xb8   :  { %1384 = vmatprep.subr.bf16.mxu0 %v5622_v7  ;;  %1556 = vmatprep.subr.bf16.mxu1 %v5625_v8 }
  0xbb   :  { %1385 = vmatpush1.bf16.msra.mxu0 %v5620_v9  ;;  %1557 = vmatpush1.bf16.msra.mxu1 %v5623_v10 }
  0xbc   :  { %1386 = vmatprep.subr.bf16.mxu0 %v5628_v11  ;;  %1558 = vmatprep.subr.bf16.mxu1 %v5631_v12 }
  0xbf   :  { %1387 = vmatpush1.bf16.msra.mxu0 %v5626_v13  ;;  %1559 = vmatpush1.bf16.msra.mxu1 %v5629_v14 }
  0xc0   :  { %1399 = vmatprep.subr.bf16.mxu0 %v5634_v17  ;;  %1571 = vmatprep.subr.bf16.mxu1 %v5637_v18 }
  0xc2   :  { %1389 = vmatmul.mubr.bf16.vlgmr.msra.gmra.mrb[0].mxu0 %v65_v21  ;;  %1561 = vmatmul.mubr.bf16.vlgmr.msra.gmra.mrb[0].mxu1 %v65_v21 }
  0xc3   :  { %1400 = vmatpush1.bf16.msra.mxu0 %v5632_v19  ;;  %1572 = vmatpush1.bf16.msra.mxu1 %v5635_v20 }
  0xc4   :  { %1431 = vmatprep.mubr.bf16.mxu0 %v6200_v24  ;;  %1603 = vmatprep.mubr.bf16.mxu1 %v6200_v24 }
  0xc5   :  { %5148 = vmatprep.subr.bf16.mxu1 %v5638_v22  ;;  %5192 = vmatprep.subr.bf16.mxu0 %v5640_v23 }
  0xce   :  { %4808 = vmatmul.mubr.msk.bf16.vlgmr.msra.gmra.mrb[0].mxu0 %vm1266_vm0, %v67_v29  ;;  %4809 = vmatmul.mubr.msk.bf16.vlgmr.msra.gmra.mrb[0].mxu1 %vm1266_vm0, %v67_v29 }
  0xcf   :  { %5149 = vmatpush3.bf16.msra.mxu1 %v5639_v27  ;;  %5193 = vmatpush3.bf16.msra.mxu0 %v5641_v28 }
  0xd0   :  { %5150 = vmatprep.subr.bf16.mxu1 %v5642_v30  ;;  %5194 = vmatprep.subr.bf16.mxu0 %v5644_v31 }
  0xd3   :  { %5151 = vmatpush3.bf16.msra.mxu1 %v5643_v32  ;;  %5195 = vmatpush3.bf16.msra.mxu0 %v5645_v33 }
  0xd4   :  { %5152 = vmatprep.subr.bf16.mxu1 %v5646_v34  ;;  %5196 = vmatprep.subr.bf16.mxu0 %v5648_v35 }
  0xd7   :  { %5153 = vmatpush3.bf16.msra.mxu1 %v5647_v36  ;;  %5197 = vmatpush3.bf16.msra.mxu0 %v5649_v37 }
  0xd8   :  { %5154 = vmatprep.subr.bf16.mxu1 %v5650_v38  ;;  %5198 = vmatprep.subr.bf16.mxu0 %v5652_v39 }
  0xdb   :  { %5155 = vmatpush3.bf16.msra.mxu1 %v5651_v40  ;;  %5199 = vmatpush3.bf16.msra.mxu0 %v5653_v41 }
  0xdc   :  { %5156 = vmatprep.subr.bf16.mxu1 %v5654_v42  ;;  %5200 = vmatprep.subr.bf16.mxu0 %v5656_v43 }
  0xdf   :  { %5157 = vmatpush3.bf16.msra.mxu1 %v5655_v44  ;;  %5201 = vmatpush3.bf16.msra.mxu0 %v5657_v45 }
  0xe0   :  { %5158 = vmatprep.subr.bf16.mxu1 %v5658_v46  ;;  %5202 = vmatprep.subr.bf16.mxu0 %v5660_v47 }
  0xe3   :  { %5159 = vmatpush3.bf16.msra.mxu1 %v5659_v48 }
  0xe4   :  { %21 = vsyncpa [#allocation5], 0  ;;  %v5661_v49 = vld [vmem:[%s8006_s6 + $0x28] sm:$0xff]   ;;  %v5662_v50 = vld [vmem:[%s8004_s4 + $0x70] sm:$0xff]   ;;  %v266_v59 = vlaneseq }
  0xe5   :  { %5203 = vmatpush3.bf16.msra.mxu0 %v5661_v49  ;;  %v5663_v51 = vld [vmem:[%s8004_s4 + $0x30] sm:$0xff]   ;;  %5160 = vmatprep.subr.bf16.mxu1 %v5662_v50  ;;  %v5666_v54 = vld [vmem:[%s8004_s4 + $0x78] sm:$0xff]   ;;  %v5670_v58 = vld [vmem:[%s8004_s4 + $0xc0] sm:$0xff]  }
  0xe6   :  { %v5664_v52 = vld [vmem:[%s8006_s6 + $0x70] sm:$0xff]   ;;  %v5667_v55 = vld [vmem:[%s8004_s4 + $0x38] sm:$0xff]   ;;  %v7014_v60 = vshrl.u32 %v266_v59, 7  ;;  %v264_v63 = vld [vmem:[%s8003_s3] sm:$0xf] }
  0xe7   :  { %v5665_v53 = vld [vmem:[%s8006_s6 + $0x30] sm:$0xff]   ;;  %5161 = vmatpush3.bf16.msra.mxu1 %v5663_v51  ;;  %5204 = vmatprep.subr.bf16.mxu0 %v5664_v52  ;;  %v5668_v56 = vld [vmem:[%s8006_s6 + $0x78] sm:$0xff]   ;;  %v5671_v35 = vld [vmem:[%s8004_s4 + $0x80] sm:$0xff]  }
  0xe8   :  { %5162 = vmatprep.subr.bf16.mxu1 %v5666_v54  ;;  %v5669_v57 = vld [vmem:[%s8006_s6 + $0x38] sm:$0xff]   ;;  %v7017_v61 = vsub.s32 0, %v7014_v60  ;;  %v7020_v62 = vsub.s32 2, %v7014_v60  ;;  %v7026_v0 = vsub.s32 1, %v7014_v60  ;;  %v7029_v1 = vsub.s32 3, %v7014_v60  ;;  %v5672_v36 = vld [vmem:[%s8004_s4 + $0xc8] sm:$0xff]  }
  0xe9   :  { %5205 = vmatpush3.bf16.msra.mxu0 %v5665_v53  ;;  %v5673_v37 = vld [vmem:[%s8004_s4 + $0x88] sm:$0xff]   ;;  %v5674_v38 = vld [vmem:[%s8004_s4 + $0xd0] sm:$0xff]   ;;  %v5676_v40 = vld [vmem:[%s8004_s4 + $0xd8] sm:$0xff]  }
  0xea   :  { %5206 = vmatprep.subr.bf16.mxu0 %v5668_v56  ;;  %v269_v2 = vrot.slane %v264_v63, %v7017_v61  ;;  %v277_v3 = vrot.slane %v264_v63, %v7020_v62  ;;  %v273_v4 = vrot.slane %v264_v63, %v7026_v0  ;;  %v281_v5 = vrot.slane %v264_v63, %v7029_v1  ;;  %v5675_v39 = vld [vmem:[%s8004_s4 + $0x90] sm:$0xff]   ;;  %v5677_v41 = vld [vmem:[%s8004_s4 + $0x98] sm:$0xff]   ;;  %v5678_v42 = vld [vmem:[%s8004_s4 + $0xe0] sm:$0xff]  }
  0xeb   :  { %5163 = vmatpush3.bf16.msra.mxu1 %v5667_v55  ;;  %v5679_v43 = vld [vmem:[%s8004_s4 + $0xa0] sm:$0xff]   ;;  %v5680_v44 = vld [vmem:[%s8004_s4 + $0xe8] sm:$0xff]   ;;  %v5682_v46 = vld [vmem:[%s8004_s4 + $0xf0] sm:$0xff]  }
  0xec   :  { %5170 = vmatprep.subr.bf16.mxu1 %v5670_v58  ;;  %v5681_v45 = vld [vmem:[%s8004_s4 + $0xa8] sm:$0xff]   ;;  %v5683_v47 = vld [vmem:[%s8004_s4 + $0xb0] sm:$0xff]   ;;  %v5684_v48 = vld [vmem:[%s8004_s4 + $0xf8] sm:$0xff]  }
  0xed   :  { %5207 = vmatpush3.bf16.msra.mxu0 %v5669_v57  ;;  %v5685_v49 = vld [vmem:[%s8004_s4 + $0xb8] sm:$0xff]   ;;  %v5686_v50 = vld [vmem:[%s8006_s6 + $0xc0] sm:$0xff]   ;;  %v5688_v52 = vld [vmem:[%s8006_s6 + $0xc8] sm:$0xff]  }
  0xee   :  { %v5687_v51 = vld [vmem:[%s8006_s6 + $0x80] sm:$0xff]   ;;  %v5689_v53 = vld [vmem:[%s8006_s6 + $0x88] sm:$0xff]   ;;  %v5690_v54 = vld [vmem:[%s8006_s6 + $0xd0] sm:$0xff]  }
  0xef   :  { %v5691_v55 = vld [vmem:[%s8006_s6 + $0x90] sm:$0xff]   ;;  %v5692_v56 = vld [vmem:[%s8006_s6 + $0xd8] sm:$0xff]   ;;  %v5694_v58 = vld [vmem:[%s8006_s6 + $0xe0] sm:$0xff]  }
  0xf0   :  { %v5693_v57 = vld [vmem:[%s8006_s6 + $0x98] sm:$0xff]   ;;  %v5695_v59 = vld [vmem:[%s8006_s6 + $0xa0] sm:$0xff]   ;;  %v5696_v63 = vld [vmem:[%s8006_s6 + $0xe8] sm:$0xff]  }
 0x1a1   :  { %v1433_v6 = vpop.f32.mrb[0].mxu0  ;;  %v1605_v7 = vpop.f32.mrb[0].mxu1 }
 0x1a2   :  { %v5280_v8 = vadd.f32 %v1433_v6, %v269_v2  ;;  %v5284_v9 = vadd.f32 %v1605_v7, %v277_v3  ;;  %v1435_v10 = vpop.f32.mrb[1].mxu0  ;;  %v1607_v11 = vpop.f32.mrb[1].mxu1  ;;  %v5701_v6 = vld [vmem:[%s8006_s6 + $0xb8] sm:$0xff]   ;;  %v5702_v7 = vld [vmem:[%s8008_s8] ss:$16 sps:$4 sm:$0xff]  }
 0x1a3   :  { %v5281_v12 = vadd.f32 %v1435_v10, %v273_v4  ;;  %v5285_v13 = vadd.f32 %v1607_v11, %v281_v5  ;;  %v1437_v14 = vpop.f32.mrb[2].mxu0  ;;  %v1609_v15 = vpop.f32.mrb[2].mxu1  ;;  %v5707_v10 = vld [vmem:[%s8008_s8 + $0xc] ss:$16 sps:$4 sm:$0xff]  }
 0x1a4   :  { %v5282_v16 = vadd.f32 %v1437_v14, %v269_v2  ;;  %v5286_v17 = vadd.f32 %v1609_v15, %v277_v3  ;;  %v1439_v18 = vpop.f32.mrb[3].mxu0  ;;  %v1611_v19 = vpop.f32.mrb[3].mxu1  ;;  %v1614_v22 = vmax.f32 %v5280_v8, 0.0  ;;  %v1616_v23 = vmax.f32 %v5284_v9, 0.0  ;;  %v5697_v2 = vld [vmem:[%s8006_s6 + $0xa8] sm:$0xff]   ;;  %v5698_v3 = vld [vmem:[%s8006_s6 + $0xf0] sm:$0xff]  }
 0x1a5   :  { %v5283_v20 = vadd.f32 %v1439_v18, %v273_v4  ;;  %v5287_v21 = vadd.f32 %v1611_v19, %v281_v5  ;;  %v1615_v27 = vmax.f32 %v5281_v12, 0.0  ;;  %v1617_v28 = vmax.f32 %v5285_v13, 0.0  ;;  %v5699_v4 = vld [vmem:[%s8006_s6 + $0xb0] sm:$0xff]   ;;  %v5700_v5 = vld [vmem:[%s8006_s6 + $0xf8] sm:$0xff]  }
 0x1a6   :  { %v1618_v25 = vmax.f32 %v5282_v16, 0.0  ;;  %v1620_v26 = vmax.f32 %v5286_v17, 0.0  ;;  %v5704_v8 = vld [vmem:[%s8008_s8 + $0x4] ss:$16 sps:$4 sm:$0xff]   ;;  %v5705_v9 = vld [vmem:[%s8008_s8 + $0x8] ss:$16 sps:$4 sm:$0xff]  }
 0x1a7   :  { %v1619_v29 = vmax.f32 %v5283_v20, 0.0  ;;  %v1621_v30 = vmax.f32 %v5287_v21, 0.0  ;;  %2541 = vmatprep.subr.bf16.mxu0 %v5704_v8  ;;  %v5713_v11 = vld [vmem:[%s8008_s8 + $0x2c] ss:$16 sps:$4 sm:$0xff]   ;;  %v5708_v12 = vld [vmem:[%s8008_s8 + $0x20] ss:$16 sps:$4 sm:$0xff]  }
 0x1a8   :  { %v1622_v31 = vpack.c.bf16 %v1618_v25, %v1614_v22  ;;  %v7035_v32 = vpack.c.bf16 %v1620_v26, %v1616_v23  ;;  %v5711_v13 = vld [vmem:[%s8008_s8 + $0x28] ss:$16 sps:$4 sm:$0xff]   ;;  %v5716_v14 = vld [vmem:[%s8008_s8 + $0x44] ss:$16 sps:$4 sm:$0xff]   ;;  %v5719_v15 = vld [vmem:[%s8008_s8 + $0x4c] ss:$16 sps:$4 sm:$0xff]  }
 0x1a9   :  { %v1623_v33 = vpack.c.bf16 %v1619_v29, %v1615_v27  ;;  %v1625_v34 = vpack.c.bf16 %v1621_v30, %v1617_v28  ;;  %v5714_v16 = vld [vmem:[%s8008_s8 + $0x40] ss:$16 sps:$4 sm:$0xff]   ;;  %v5717_v17 = vld [vmem:[%s8008_s8 + $0x48] ss:$16 sps:$4 sm:$0xff]   ;;  %v5722_v18 = vld [vmem:[%s8008_s8 + $0x64] ss:$16 sps:$4 sm:$0xff]  }
 0x1aa   :  { %v5725_v19 = vld [vmem:[%s8008_s8 + $0x6c] ss:$16 sps:$4 sm:$0xff]   ;;  %v5720_v20 = vld [vmem:[%s8008_s8 + $0x60] ss:$16 sps:$4 sm:$0xff]   ;;  %v5723_v21 = vld [vmem:[%s8008_s8 + $0x68] ss:$16 sps:$4 sm:$0xff]  }
 0x1ab   :  { %1921 = vmatprep.mubr.bf16.mxu1 %v1623_v33  ;;  %2266 = vmatprep.mubr.bf16.mxu0 %v1623_v33  ;;  %v5728_v22 = vld [vmem:[%s8008_s8 + $0x84] ss:$16 sps:$4 sm:$0xff]   ;;  %v5731_v23 = vld [vmem:[%s8008_s8 + $0x8c] ss:$16 sps:$4 sm:$0xff]   ;;  %v5726_v25 = vld [vmem:[%s8008_s8 + $0x80] ss:$16 sps:$4 sm:$0xff]  }
 0x1ac   :  { %1922 = vmatmul.mubr.bf16.vlgmr.msra.gmra.mrb[4].mxu1 %v1622_v31  ;;  %2267 = vmatmul.mubr.bf16.vlgmr.msra.gmra.mrb[4].mxu0 %v1622_v31  ;;  %v5729_v26 = vld [vmem:[%s8008_s8 + $0x88] ss:$16 sps:$4 sm:$0xff]   ;;  %v5734_v27 = vld [vmem:[%s8008_s8 + $0xa4] ss:$16 sps:$4 sm:$0xff]   ;;  %v5737_v28 = vld [vmem:[%s8008_s8 + $0xac] ss:$16 sps:$4 sm:$0xff]  }
 0x1ad   :  { %5171 = vmatpush3.bf16.msra.mxu1 %v5671_v35  ;;  %1962 = vmatprep.mubr.bf16.mxu1 %v1625_v34  ;;  %v5732_v29 = vld [vmem:[%s8008_s8 + $0xa0] ss:$16 sps:$4 sm:$0xff]   ;;  %v5735_v30 = vld [vmem:[%s8008_s8 + $0xa8] ss:$16 sps:$4 sm:$0xff]   ;;  %v5740_v31 = vld [vmem:[%s8008_s8 + $0xc4] ss:$16 sps:$4 sm:$0xff]  }
 0x1ae   :  { %5172 = vmatprep.subr.bf16.mxu1 %v5672_v36  ;;  %2573 = vmatprep.mubr.bf16.mxu0 %v6200_v24  ;;  %v5738_v33 = vld [vmem:[%s8008_s8 + $0xc0] ss:$16 sps:$4 sm:$0xff]   ;;  %v5746_v35 = vld [vmem:[%s8008_s8 + $0xe4] ss:$16 sps:$4 sm:$0xff]   ;;  %v5749_v36 = vld [vmem:[%s8008_s8 + $0xec] ss:$16 sps:$4 sm:$0xff]  }
 0x1af   :  { %2542 = vmatpush1.bf16.msra.mxu0 %v5702_v7 }
 0x1b1   :  { %5173 = vmatpush3.bf16.msra.mxu1 %v5673_v37  ;;  %v5744_v37 = vld [vmem:[%s8008_s8 + $0xe0] ss:$16 sps:$4 sm:$0xff]  }
 0x1b2   :  { %5174 = vmatprep.subr.bf16.mxu1 %v5674_v38  ;;  %v5747_v38 = vld [vmem:[%s8008_s8 + $0xe8] ss:$16 sps:$4 sm:$0xff]  }
 0x1b5   :  { %5175 = vmatpush3.bf16.msra.mxu1 %v5675_v39  ;;  %v5752_v39 = vld [vmem:[%s8010_s10 + $0x4] ss:$28 sps:$4 sm:$0xff]  }
 0x1b6   :  { %5176 = vmatprep.subr.bf16.mxu1 %v5676_v40  ;;  %v5755_v40 = vld [vmem:[%s8010_s10 + $0xc] ss:$28 sps:$4 sm:$0xff]  }
 0x1b9   :  { %5177 = vmatpush3.bf16.msra.mxu1 %v5677_v41 }
 0x1ba   :  { %5178 = vmatprep.subr.bf16.mxu1 %v5678_v42 }
 0x1bd   :  { %5179 = vmatpush3.bf16.msra.mxu1 %v5679_v43 }
 0x1be   :  { %5180 = vmatprep.subr.bf16.mxu1 %v5680_v44 }
 0x1c1   :  { %5181 = vmatpush3.bf16.msra.mxu1 %v5681_v45 }
 0x1c2   :  { %5182 = vmatprep.subr.bf16.mxu1 %v5682_v46 }
 0x1c5   :  { %5183 = vmatpush3.bf16.msra.mxu1 %v5683_v47 }
 0x1c6   :  { %5184 = vmatprep.subr.bf16.mxu1 %v5684_v48 }
 0x1c9   :  { %5185 = vmatpush3.bf16.msra.mxu1 %v5685_v49 }
 0x1ca   :  { %5214 = vmatprep.subr.bf16.mxu1 %v5686_v50 }
 0x1cc   :  { %1963 = vmatmul.mubr.bf16.vlgmr.msra.gmra.mrb[8].mxu1 %v7035_v32 }
 0x1cd   :  { %5215 = vmatpush3.bf16.msra.mxu1 %v5687_v51  ;;  %2307 = vmatprep.mubr.bf16.mxu1 %v1625_v34  ;;  %v5741_v34 = vld [vmem:[%s8008_s8 + $0xc8] ss:$16 sps:$4 sm:$0xff]  }
 0x1ce   :  { %5216 = vmatprep.subr.bf16.mxu1 %v5688_v52 }
 0x1d1   :  { %5217 = vmatpush3.bf16.msra.mxu1 %v5689_v53  ;;  %v4810_v53 = vld [vmem:[%s8005_s5] ss:$0 sm:$0xff] }
 0x1d2   :  { %5218 = vmatprep.subr.bf16.mxu1 %v5690_v54 }
 0x1d5   :  { %5219 = vmatpush3.bf16.msra.mxu1 %v5691_v55 }
 0x1d6   :  { %5220 = vmatprep.subr.bf16.mxu1 %v5692_v56 }
 0x1d9   :  { %5221 = vmatpush3.bf16.msra.mxu1 %v5693_v57 }
 0x1da   :  { %5222 = vmatprep.subr.bf16.mxu1 %v5694_v58 }
 0x1dd   :  { %5223 = vmatpush3.bf16.msra.mxu1 %v5695_v59 }
 0x1de   :  { %5224 = vmatprep.subr.bf16.mxu1 %v5696_v63 }
 0x1e1   :  { %5225 = vmatpush3.bf16.msra.mxu1 %v5697_v2 }
 0x1e2   :  { %5226 = vmatprep.subr.bf16.mxu1 %v5698_v3 }
 0x1e5   :  { %5227 = vmatpush3.bf16.msra.mxu1 %v5699_v4 }
 0x1e6   :  { %5228 = vmatprep.subr.bf16.mxu1 %v5700_v5  ;;  %v4843_v5 = vld [vmem:[%s8007_s7] ss:$0 sm:$0xff] }
 0x1e9   :  { %5229 = vmatpush3.bf16.msra.mxu1 %v5701_v6 }
 0x1ea   :  { %2584 = vmatprep.subr.bf16.mxu1 %v5707_v10 }
 0x1ec   :  { %2308 = vmatmul.mubr.bf16.vlgmr.msra.gmra.mrb[12].mxu1 %v7035_v32  ;;  %v5743_v32 = vld [vmem:[%s8008_s8 + $0xcc] ss:$16 sps:$4 sm:$0xff]  }
 0x1ed   :  { %2616 = vmatprep.mubr.bf16.mxu1 %v6200_v24  ;;  %v5710_v24 = vld [vmem:[%s8008_s8 + $0x24] ss:$16 sps:$4 sm:$0xff]   ;;  %2585 = vmatpush1.bf16.msra.mxu1 %v5705_v9 }
 0x1ee   :  { %2543 = vmatprep.subr.bf16.mxu0 %v5710_v24  ;;  %2586 = vmatprep.subr.bf16.mxu1 %v5713_v11 }
 0x1ef   :  { %2544 = vmatpush1.bf16.msra.mxu0 %v5708_v12 }
 0x1f0   :  { %2545 = vmatprep.subr.bf16.mxu0 %v5716_v14 }
 0x1f1   :  { %2587 = vmatpush1.bf16.msra.mxu1 %v5711_v13 }
 0x1f2   :  { %2588 = vmatprep.subr.bf16.mxu1 %v5719_v15 }
 0x1f3   :  { %2546 = vmatpush1.bf16.msra.mxu0 %v5714_v16 }
 0x1f4   :  { %2547 = vmatprep.subr.bf16.mxu0 %v5722_v18 }
 0x1f5   :  { %2589 = vmatpush1.bf16.msra.mxu1 %v5717_v17  ;;  %v2320_v17 = vld [vmem:[%s8001_s1] sm:$0xff] }
 0x1f6   :  { %2590 = vmatprep.subr.bf16.mxu1 %v5725_v19  ;;  %v2321_v19 = vld [vmem:[%s8001_s1 + $0x8] sm:$0xff] }
 0x1f7   :  { %2548 = vmatpush1.bf16.msra.mxu0 %v5720_v20 }
 0x1f8   :  { %2549 = vmatprep.subr.bf16.mxu0 %v5728_v22 }
 0x1f9   :  { %2591 = vmatpush1.bf16.msra.mxu1 %v5723_v21 }
 0x1fa   :  { %2592 = vmatprep.subr.bf16.mxu1 %v5731_v23 }
 0x1fb   :  { %2550 = vmatpush1.bf16.msra.mxu0 %v5726_v25 }
 0x1fc   :  { %2551 = vmatprep.subr.bf16.mxu0 %v5734_v27  ;;  %v5753_v27 = vld [vmem:[%s8010_s10 + $0x8] ss:$28 sps:$4 sm:$0xff]  }
 0x1fd   :  { %2593 = vmatpush1.bf16.msra.mxu1 %v5729_v26  ;;  %v5750_v26 = vld [vmem:[%s8010_s10] ss:$28 sps:$4 sm:$0xff]  }
 0x1fe   :  { %2594 = vmatprep.subr.bf16.mxu1 %v5737_v28 }
 0x1ff   :  { %2552 = vmatpush1.bf16.msra.mxu0 %v5732_v29  ;;  %v5758_v29 = vld [vmem:[%s8010_s10 + $0x3c] ss:$28 sps:$4 sm:$0xff]  }
 0x200   :  { %2553 = vmatprep.subr.bf16.mxu0 %v5740_v31  ;;  %v5756_v31 = vld [vmem:[%s8010_s10 + $0x38] ss:$28 sps:$4 sm:$0xff]  }
 0x201   :  { %2595 = vmatpush1.bf16.msra.mxu1 %v5735_v30  ;;  %v5761_v30 = vld [vmem:[%s8010_s10 + $0x44] ss:$28 sps:$4 sm:$0xff]  }
 0x202   :  { %2596 = vmatprep.subr.bf16.mxu1 %v5743_v32  ;;  %v5759_v32 = vld [vmem:[%s8010_s10 + $0x40] ss:$28 sps:$4 sm:$0xff]  }
 0x203   :  { %2554 = vmatpush1.bf16.msra.mxu0 %v5738_v33  ;;  %v5764_v33 = vld [vmem:[%s8010_s10 + $0x74] ss:$28 sps:$4 sm:$0xff]  }
 0x204   :  { %2555 = vmatprep.subr.bf16.mxu0 %v5746_v35  ;;  %v5762_v35 = vld [vmem:[%s8010_s10 + $0x70] ss:$28 sps:$4 sm:$0xff]  }
 0x205   :  { %2597 = vmatpush1.bf16.msra.mxu1 %v5741_v34  ;;  %v5767_v34 = vld [vmem:[%s8010_s10 + $0x7c] ss:$28 sps:$4 sm:$0xff]  }
 0x206   :  { %2598 = vmatprep.subr.bf16.mxu1 %v5749_v36  ;;  %v5765_v36 = vld [vmem:[%s8010_s10 + $0x78] ss:$28 sps:$4 sm:$0xff]  }
 0x207   :  { %2556 = vmatpush1.bf16.msra.mxu0 %v5744_v37  ;;  %v5770_v37 = vld [vmem:[%s8010_s10 + $0xac] ss:$28 sps:$4 sm:$0xff]  }
 0x208   :  { %4084 = vmatprep.subr.bf16.mxu0 %v5752_v39  ;;  %v5768_v39 = vld [vmem:[%s8010_s10 + $0xa8] ss:$28 sps:$4 sm:$0xff]  }
 0x209   :  { %2599 = vmatpush1.bf16.msra.mxu1 %v5747_v38  ;;  %v5773_v38 = vld [vmem:[%s8010_s10 + $0xb4] ss:$28 sps:$4 sm:$0xff]  }
 0x20a   :  { %4170 = vmatprep.subr.bf16.mxu1 %v5755_v40  ;;  %v5771_v40 = vld [vmem:[%s8010_s10 + $0xb0] ss:$28 sps:$4 sm:$0xff]  }
 0x27f   :  { %v5164_v41 = vpop.f32.mrb[4].mxu1  ;;  %v5208_v42 = vpop.f32.mrb[4].mxu0 }
 0x280   :  { %v5165_v43 = vpop.f32.mrb[5].mxu1  ;;  %v5209_v44 = vpop.f32.mrb[5].mxu0 }
 0x281   :  { %v5166_v45 = vadd.f32 %v5165_v43, %v5164_v41  ;;  %v5210_v46 = vadd.f32 %v5209_v44, %v5208_v42  ;;  %v5167_v47 = vpop.f32.mrb[6].mxu1  ;;  %v5211_v48 = vpop.f32.mrb[6].mxu0  ;;  %v5776_v41 = vld [vmem:[%s8010_s10 + $0xe4] ss:$28 sps:$4 sm:$0xff]   ;;  %v5779_v42 = vld [vmem:[%s8010_s10 + $0xec] ss:$28 sps:$4 sm:$0xff]  }
 0x282   :  { %v5168_v49 = vpop.f32.mrb[7].mxu1  ;;  %v5212_v50 = vpop.f32.mrb[7].mxu0  ;;  %v5774_v43 = vld [vmem:[%s8010_s10 + $0xe0] ss:$28 sps:$4 sm:$0xff]   ;;  %v5777_v44 = vld [vmem:[%s8010_s10 + $0xe8] ss:$28 sps:$4 sm:$0xff]  }
 0x283   :  { %v5169_v51 = vadd.f32 %v5168_v49, %v5167_v47  ;;  %v5213_v52 = vadd.f32 %v5212_v50, %v5211_v48  ;;  %v1924_v56 = vadd.f32 %v5166_v45, %v4810_v53  ;;  %v2269_v8 = vadd.f32 %v5210_v46, %v4843_v5  ;;  %v5782_v45 = vld [vmem:[%s8010_s10 + $0x11c] ss:$28 sps:$4 sm:$0xff]   ;;  %v5785_v46 = vld [vmem:[%s8010_s10 + $0x124] ss:$28 sps:$4 sm:$0xff]   ;;  %v5788_v49 = vld [vmem:[%s8010_s10 + $0x154] ss:$28 sps:$4 sm:$0xff]  }
 0x284   :  { %v5780_v47 = vld [vmem:[%s8010_s10 + $0x118] ss:$28 sps:$4 sm:$0xff]   ;;  %v5783_v48 = vld [vmem:[%s8010_s10 + $0x120] ss:$28 sps:$4 sm:$0xff]  }
 0x285   :  { %v1927_v63 = vadd.f32 %v5169_v51, %v4810_v53  ;;  %v2272_v11 = vadd.f32 %v5213_v52, %v4843_v5  ;;  %v5791_v50 = vld [vmem:[%s8010_s10 + $0x15c] ss:$28 sps:$4 sm:$0xff]   ;;  %v5786_v51 = vld [vmem:[%s8010_s10 + $0x150] ss:$28 sps:$4 sm:$0xff]  }
 0x286   :  { %v5789_v52 = vld [vmem:[%s8010_s10 + $0x158] ss:$28 sps:$4 sm:$0xff]   ;;  %v5794_v53 = vld [vmem:[%s8010_s10 + $0x18c] ss:$28 sps:$4 sm:$0xff]   ;;  %v5807_v5 = vld [vmem:[%s8010_s10 + $0x200] ss:$28 sps:$4 sm:$0xff]  }
 0x29f   :  { %v5186_v54 = vpop.f32.mrb[8].mxu1 }
 0x2a0   :  { %v5187_v55 = vpop.f32.mrb[9].mxu1 }
 0x2a1   :  { %v5188_v57 = vadd.f32 %v5187_v55, %v5186_v54  ;;  %v5189_v58 = vpop.f32.mrb[10].mxu1  ;;  %v5797_v54 = vld [vmem:[%s8010_s10 + $0x194] ss:$28 sps:$4 sm:$0xff]   ;;  %v5792_v55 = vld [vmem:[%s8010_s10 + $0x188] ss:$28 sps:$4 sm:$0xff]  }
 0x2a2   :  { %v5190_v59 = vpop.f32.mrb[11].mxu1 }
 0x2a3   :  { %v1965_v2 = vadd.f32 %v5188_v57, %v1924_v56  ;;  %v5191_v3 = vadd.f32 %v5190_v59, %v5189_v58  ;;  %v5795_v56 = vld [vmem:[%s8010_s10 + $0x190] ss:$28 sps:$4 sm:$0xff]   ;;  %v5800_v57 = vld [vmem:[%s8010_s10 + $0x1c4] ss:$28 sps:$4 sm:$0xff]  }
 0x2a4   :  { %v5803_v58 = vld [vmem:[%s8010_s10 + $0x1cc] ss:$28 sps:$4 sm:$0xff]   ;;  %v5798_v59 = vld [vmem:[%s8010_s10 + $0x1c0] ss:$28 sps:$4 sm:$0xff]  }
 0x2a5   :  { %4561 = vst [vmem:[#allocation4] sm:$0xff] %v1965_v2  ;;  %v1968_v4 = vadd.f32 %v5191_v3, %v1927_v63  ;;  %v5801_v63 = vld [vmem:[%s8010_s10 + $0x1c8] ss:$28 sps:$4 sm:$0xff]  }
 0x2a6   :  { %v5809_v3 = vld [vmem:[%s8010_s10 + $0x204] ss:$28 sps:$4 sm:$0xff]  }
 0x2a7   :  { %4562 = vst [vmem:[#allocation4 + $0x8] sm:$0xff] %v1968_v4 }
 0x2bf   :  { %v5230_v6 = vpop.f32.mrb[12].mxu1 }
 0x2c0   :  { %v5231_v7 = vpop.f32.mrb[13].mxu1 }
 0x2c1   :  { %v5232_v9 = vadd.f32 %v5231_v7, %v5230_v6  ;;  %v5233_v10 = vpop.f32.mrb[14].mxu1  ;;  %v5812_v6 = vld [vmem:[%s8010_s10 + $0x234] ss:$28 sps:$4 sm:$0xff]   ;;  %v5815_v7 = vld [vmem:[%s8010_s10 + $0x23c] ss:$28 sps:$4 sm:$0xff]  }
 0x2c2   :  { %v5234_v24 = vpop.f32.mrb[15].mxu1 }
 0x2c3   :  { %v2310_v12 = vadd.f32 %v5232_v9, %v2269_v8  ;;  %v5235_v13 = vadd.f32 %v5234_v24, %v5233_v10  ;;  %v5810_v8 = vld [vmem:[%s8010_s10 + $0x230] ss:$28 sps:$4 sm:$0xff]   ;;  %v5813_v9 = vld [vmem:[%s8010_s10 + $0x238] ss:$28 sps:$4 sm:$0xff]  }
 0x2c4   :  { %v5818_v10 = vld [vmem:[%s8010_s10 + $0x26c] ss:$28 sps:$4 sm:$0xff]   ;;  %v5821_v24 = vld [vmem:[%s8010_s10 + $0x274] ss:$28 sps:$4 sm:$0xff]  }
 0x2c5   :  { %v2316_v14 = vmul.f32 1.442695, %v2310_v12  ;;  %v2313_v15 = vadd.f32 %v5235_v13, %v2272_v11  ;;  %v5816_v11 = vld [vmem:[%s8010_s10 + $0x268] ss:$28 sps:$4 sm:$0xff]   ;;  %v5819_v12 = vld [vmem:[%s8010_s10 + $0x270] ss:$28 sps:$4 sm:$0xff]  }
 0x2c6   :  { %v5824_v13 = vld [vmem:[%s8010_s10 + $0x2a4] ss:$28 sps:$4 sm:$0xff]  }
 0x2c7   :  { %6070 = vpow2.f32 %v2316_v14  ;;  %v2318_v16 = vmul.f32 1.442695, %v2313_v15  ;;  %v5827_v14 = vld [vmem:[%s8010_s10 + $0x2ac] ss:$28 sps:$4 sm:$0xff]   ;;  %v5822_v15 = vld [vmem:[%s8010_s10 + $0x2a0] ss:$28 sps:$4 sm:$0xff]  }
 0x2c9   :  { %6072 = vpow2.f32 %v2318_v16  ;;  %v5825_v16 = vld [vmem:[%s8010_s10 + $0x2a8] ss:$28 sps:$4 sm:$0xff]  }
 0x2d1   :  { %v6071_v18 = vpop.eup %6070 }
 0x2d2   :  { %v2322_v20 = vmul.f32 %v6071_v18, %v2320_v17  ;;  %v5830_v17 = vld [vmem:[%s8010_s10 + $0x2dc] ss:$28 sps:$4 sm:$0xff]   ;;  %v5833_v18 = vld [vmem:[%s8010_s10 + $0x2e4] ss:$28 sps:$4 sm:$0xff]  }
 0x2d3   :  { %v6073_v21 = vpop.eup %6072 }
 0x2d4   :  { %v2323_v22 = vmul.f32 %v6073_v21, %v2321_v19  ;;  %v2324_v23 = vadd.f32 %v2322_v20, %v1965_v2  ;;  %v5806_v2 = vld [vmem:[%s8010_s10 + $0x1fc] ss:$28 sps:$4 sm:$0xff]   ;;  %v5836_v21 = vld [vmem:[%s8010_s10 + $0x314] ss:$28 sps:$4 sm:$0xff]  }
 0x2d5   :  { %v5828_v19 = vld [vmem:[%s8010_s10 + $0x2d8] ss:$28 sps:$4 sm:$0xff]   ;;  %v5831_v20 = vld [vmem:[%s8010_s10 + $0x2e0] ss:$28 sps:$4 sm:$0xff]  }
 0x2d6   :  { %v2325_v25 = vadd.f32 %v2323_v22, %v1968_v4  ;;  %4563 = vst [vmem:[#allocation6] sm:$0xff] %v2324_v23  ;;  %v5804_v4 = vld [vmem:[%s8010_s10 + $0x1f8] ss:$28 sps:$4 sm:$0xff]  }
 0x2d7   :  { %v5839_v22 = vld [vmem:[%s8010_s10 + $0x31c] ss:$28 sps:$4 sm:$0xff]  }
 0x2d8   :  { %v2326_v28 = vpack.c.bf16 %v2325_v25, %v2324_v23  ;;  %4564 = vst [vmem:[#allocation6 + $0x8] sm:$0xff] %v2325_v25  ;;  %v5834_v23 = vld [vmem:[%s8010_s10 + $0x310] ss:$28 sps:$4 sm:$0xff]   ;;  %v5837_v25 = vld [vmem:[%s8010_s10 + $0x318] ss:$28 sps:$4 sm:$0xff]  }
 0x2da   :  { %2574 = vmatmul.mubr.bf16.vlgmr.msra.gmra.mrb[8].mxu0 %v2326_v28  ;;  %2617 = vmatmul.mubr.bf16.vlgmr.msra.gmra.mrb[16].mxu1 %v2326_v28  ;;  %v5840_v28 = vld [vmem:[%s8010_s10 + $0x348] ss:$28 sps:$4 sm:$0xff]  }
 0x2db   :  { %4085 = vmatpush1.bf16.msra.mxu0 %v5750_v26  ;;  %4171 = vmatpush1.bf16.msra.mxu1 %v5753_v27  ;;  %v5842_v26 = vld [vmem:[%s8010_s10 + $0x34c] ss:$28 sps:$4 sm:$0xff]   ;;  %v5845_v27 = vld [vmem:[%s8010_s10 + $0x354] ss:$28 sps:$4 sm:$0xff]  }
 0x2dc   :  { %4086 = vmatprep.subr.bf16.mxu0 %v5758_v29  ;;  %4172 = vmatprep.subr.bf16.mxu1 %v5761_v30  ;;  %v5843_v29 = vld [vmem:[%s8010_s10 + $0x350] ss:$28 sps:$4 sm:$0xff]   ;;  %v5848_v30 = vld [vmem:[%s8010_s10 + $0x384] ss:$28 sps:$4 sm:$0xff]  }
 0x2df   :  { %4087 = vmatpush1.bf16.msra.mxu0 %v5756_v31  ;;  %4173 = vmatpush1.bf16.msra.mxu1 %v5759_v32  ;;  %v5851_v31 = vld [vmem:[%s8010_s10 + $0x38c] ss:$28 sps:$4 sm:$0xff]   ;;  %v2359_v32 = vld [vmem:[%s8009_s9] sm:$0xf] }
 0x2e0   :  { %4088 = vmatprep.subr.bf16.mxu0 %v5764_v33  ;;  %4174 = vmatprep.subr.bf16.mxu1 %v5767_v34  ;;  %v2364_v33 = vrot.slane %v2359_v32, %v7017_v61  ;;  %v2372_v34 = vrot.slane %v2359_v32, %v7020_v62 }
 0x2e3   :  { %4089 = vmatpush1.bf16.msra.mxu0 %v5762_v35  ;;  %4175 = vmatpush1.bf16.msra.mxu1 %v5765_v36  ;;  %v2368_v35 = vrot.slane %v2359_v32, %v7026_v0  ;;  %v2376_v36 = vrot.slane %v2359_v32, %v7029_v1  ;;  %v5890_v32 = vld [vmem:[%s8010_s10 + $0x50c] ss:$28 sps:$4 sm:$0xff]  }
 0x2e4   :  { %4090 = vmatprep.subr.bf16.mxu0 %v5770_v37  ;;  %4176 = vmatprep.subr.bf16.mxu1 %v5773_v38 }
 0x2e7   :  { %4091 = vmatpush1.bf16.msra.mxu0 %v5768_v39  ;;  %4177 = vmatpush1.bf16.msra.mxu1 %v5771_v40 }
 0x2e8   :  { %4092 = vmatprep.subr.bf16.mxu0 %v5776_v41  ;;  %4178 = vmatprep.subr.bf16.mxu1 %v5779_v42 }
 0x2eb   :  { %4093 = vmatpush1.bf16.msra.mxu0 %v5774_v43  ;;  %4179 = vmatpush1.bf16.msra.mxu1 %v5777_v44 }
 0x2ec   :  { %4094 = vmatprep.subr.bf16.mxu0 %v5782_v45  ;;  %4180 = vmatprep.subr.bf16.mxu1 %v5785_v46 }
 0x2ef   :  { %4095 = vmatpush1.bf16.msra.mxu0 %v5780_v47  ;;  %4181 = vmatpush1.bf16.msra.mxu1 %v5783_v48 }
 0x2f0   :  { %4096 = vmatprep.subr.bf16.mxu0 %v5788_v49  ;;  %4182 = vmatprep.subr.bf16.mxu1 %v5791_v50 }
 0x2f3   :  { %4097 = vmatpush1.bf16.msra.mxu0 %v5786_v51  ;;  %4183 = vmatpush1.bf16.msra.mxu1 %v5789_v52 }
 0x2f4   :  { %4098 = vmatprep.subr.bf16.mxu0 %v5794_v53  ;;  %4184 = vmatprep.subr.bf16.mxu1 %v5797_v54 }
 0x2f7   :  { %4099 = vmatpush1.bf16.msra.mxu0 %v5792_v55  ;;  %4185 = vmatpush1.bf16.msra.mxu1 %v5795_v56 }
 0x2f8   :  { %4100 = vmatprep.subr.bf16.mxu0 %v5800_v57  ;;  %4186 = vmatprep.subr.bf16.mxu1 %v5803_v58 }
 0x2fb   :  { %4101 = vmatpush1.bf16.msra.mxu0 %v5798_v59  ;;  %4187 = vmatpush1.bf16.msra.mxu1 %v5801_v63 }
 0x2fc   :  { %4102 = vmatprep.subr.bf16.mxu0 %v5806_v2  ;;  %4188 = vmatprep.subr.bf16.mxu1 %v5809_v3 }
 0x2ff   :  { %4103 = vmatpush1.bf16.msra.mxu0 %v5804_v4  ;;  %4189 = vmatpush1.bf16.msra.mxu1 %v5807_v5 }
 0x300   :  { %4104 = vmatprep.subr.bf16.mxu0 %v5812_v6  ;;  %4190 = vmatprep.subr.bf16.mxu1 %v5815_v7  ;;  %v5846_v6 = vld [vmem:[%s8010_s10 + $0x380] ss:$28 sps:$4 sm:$0xff]   ;;  %v5849_v7 = vld [vmem:[%s8010_s10 + $0x388] ss:$28 sps:$4 sm:$0xff]  }
 0x303   :  { %4105 = vmatpush1.bf16.msra.mxu0 %v5810_v8  ;;  %4191 = vmatpush1.bf16.msra.mxu1 %v5813_v9  ;;  %v5854_v8 = vld [vmem:[%s8010_s10 + $0x3bc] ss:$28 sps:$4 sm:$0xff]   ;;  %v5857_v9 = vld [vmem:[%s8010_s10 + $0x3c4] ss:$28 sps:$4 sm:$0xff]  }
 0x304   :  { %4106 = vmatprep.subr.bf16.mxu0 %v5818_v10  ;;  %4192 = vmatprep.subr.bf16.mxu1 %v5821_v24  ;;  %v5852_v10 = vld [vmem:[%s8010_s10 + $0x3b8] ss:$28 sps:$4 sm:$0xff]   ;;  %v5855_v24 = vld [vmem:[%s8010_s10 + $0x3c0] ss:$28 sps:$4 sm:$0xff]  }
 0x307   :  { %4107 = vmatpush1.bf16.msra.mxu0 %v5816_v11  ;;  %4193 = vmatpush1.bf16.msra.mxu1 %v5819_v12  ;;  %v5860_v11 = vld [vmem:[%s8010_s10 + $0x3f4] ss:$28 sps:$4 sm:$0xff]   ;;  %v5863_v12 = vld [vmem:[%s8010_s10 + $0x3fc] ss:$28 sps:$4 sm:$0xff]  }
 0x308   :  { %4108 = vmatprep.subr.bf16.mxu0 %v5824_v13  ;;  %4194 = vmatprep.subr.bf16.mxu1 %v5827_v14  ;;  %v5858_v13 = vld [vmem:[%s8010_s10 + $0x3f0] ss:$28 sps:$4 sm:$0xff]   ;;  %v5861_v14 = vld [vmem:[%s8010_s10 + $0x3f8] ss:$28 sps:$4 sm:$0xff]  }
 0x30b   :  { %4109 = vmatpush1.bf16.msra.mxu0 %v5822_v15  ;;  %4195 = vmatpush1.bf16.msra.mxu1 %v5825_v16  ;;  %v5866_v15 = vld [vmem:[%s8010_s10 + $0x42c] ss:$28 sps:$4 sm:$0xff]   ;;  %v5869_v16 = vld [vmem:[%s8010_s10 + $0x434] ss:$28 sps:$4 sm:$0xff]  }
 0x30c   :  { %4110 = vmatprep.subr.bf16.mxu0 %v5830_v17  ;;  %4196 = vmatprep.subr.bf16.mxu1 %v5833_v18  ;;  %v5864_v17 = vld [vmem:[%s8010_s10 + $0x428] ss:$28 sps:$4 sm:$0xff]   ;;  %v5867_v18 = vld [vmem:[%s8010_s10 + $0x430] ss:$28 sps:$4 sm:$0xff]  }
 0x30f   :  { %4111 = vmatpush1.bf16.msra.mxu0 %v5828_v19  ;;  %4197 = vmatpush1.bf16.msra.mxu1 %v5831_v20  ;;  %v5872_v19 = vld [vmem:[%s8010_s10 + $0x464] ss:$28 sps:$4 sm:$0xff]   ;;  %v5875_v20 = vld [vmem:[%s8010_s10 + $0x46c] ss:$28 sps:$4 sm:$0xff]  }
 0x310   :  { %4112 = vmatprep.subr.bf16.mxu0 %v5836_v21  ;;  %4198 = vmatprep.subr.bf16.mxu1 %v5839_v22  ;;  %v5870_v21 = vld [vmem:[%s8010_s10 + $0x460] ss:$28 sps:$4 sm:$0xff]   ;;  %v5873_v22 = vld [vmem:[%s8010_s10 + $0x468] ss:$28 sps:$4 sm:$0xff]  }
 0x313   :  { %4113 = vmatpush1.bf16.msra.mxu0 %v5834_v23  ;;  %4199 = vmatpush1.bf16.msra.mxu1 %v5837_v25  ;;  %v5878_v23 = vld [vmem:[%s8010_s10 + $0x49c] ss:$28 sps:$4 sm:$0xff]   ;;  %v5881_v25 = vld [vmem:[%s8010_s10 + $0x4a4] ss:$28 sps:$4 sm:$0xff]  }
 0x314   :  { %4114 = vmatprep.subr.bf16.mxu0 %v5842_v26  ;;  %4200 = vmatprep.subr.bf16.mxu1 %v5845_v27  ;;  %v5876_v26 = vld [vmem:[%s8010_s10 + $0x498] ss:$28 sps:$4 sm:$0xff]   ;;  %v5879_v27 = vld [vmem:[%s8010_s10 + $0x4a0] ss:$28 sps:$4 sm:$0xff]  }
 0x317   :  { %4115 = vmatpush1.bf16.msra.mxu0 %v5840_v28  ;;  %4201 = vmatpush1.bf16.msra.mxu1 %v5843_v29  ;;  %v5884_v28 = vld [vmem:[%s8010_s10 + $0x4d4] ss:$28 sps:$4 sm:$0xff]   ;;  %v5887_v29 = vld [vmem:[%s8010_s10 + $0x4dc] ss:$28 sps:$4 sm:$0xff]  }
 0x318   :  { %4127 = vmatprep.subr.bf16.mxu0 %v5848_v30  ;;  %4213 = vmatprep.subr.bf16.mxu1 %v5851_v31  ;;  %v5882_v30 = vld [vmem:[%s8010_s10 + $0x4d0] ss:$28 sps:$4 sm:$0xff]   ;;  %v5885_v31 = vld [vmem:[%s8010_s10 + $0x4d8] ss:$28 sps:$4 sm:$0xff]  }
 0x3ad   :  { %v2575_v37 = vpop.f32.mrb[8].mxu0  ;;  %v2618_v38 = vpop.f32.mrb[16].mxu1 }
 0x3ae   :  { %v2576_v39 = vadd.f32 %v2575_v37, %v2364_v33  ;;  %v2619_v40 = vadd.f32 %v2618_v38, %v2372_v34  ;;  %v2577_v41 = vpop.f32.mrb[9].mxu0  ;;  %v2620_v42 = vpop.f32.mrb[17].mxu1  ;;  %v5899_v37 = vld [vmem:[%s8010_s10 + $0x54c] ss:$28 sps:$4 sm:$0xff]   ;;  %v5894_v38 = vld [vmem:[%s8010_s10 + $0x540] ss:$28 sps:$4 sm:$0xff]  }
 0x3af   :  { %v2578_v43 = vadd.f32 %v2577_v41, %v2368_v35  ;;  %v2621_v44 = vadd.f32 %v2620_v42, %v2376_v36  ;;  %v2579_v45 = vpop.f32.mrb[10].mxu0  ;;  %v2622_v46 = vpop.f32.mrb[18].mxu1  ;;  %v5905_v41 = vld [vmem:[%s8010_s10 + $0x584] ss:$28 sps:$4 sm:$0xff]   ;;  %v5900_v42 = vld [vmem:[%s8010_s10 + $0x578] ss:$28 sps:$4 sm:$0xff]  }
 0x3b0   :  { %v2580_v47 = vadd.f32 %v2579_v45, %v2364_v33  ;;  %v2623_v48 = vadd.f32 %v2622_v46, %v2372_v34  ;;  %v2581_v49 = vpop.f32.mrb[11].mxu0  ;;  %v2624_v50 = vpop.f32.mrb[19].mxu1  ;;  %v2627_v53 = vmax.f32 %v2576_v39, 0.0  ;;  %v2629_v54 = vmax.f32 %v2619_v40, 0.0  ;;  %v5893_v33 = vld [vmem:[%s8010_s10 + $0x514] ss:$28 sps:$4 sm:$0xff]  }
 0x3b1   :  { %v2582_v51 = vadd.f32 %v2581_v49, %v2368_v35  ;;  %v2625_v52 = vadd.f32 %v2624_v50, %v2376_v36  ;;  %v2628_v57 = vmax.f32 %v2578_v43, 0.0  ;;  %v2630_v58 = vmax.f32 %v2621_v44, 0.0  ;;  %v5888_v34 = vld [vmem:[%s8010_s10 + $0x508] ss:$28 sps:$4 sm:$0xff]   ;;  %v5891_v35 = vld [vmem:[%s8010_s10 + $0x510] ss:$28 sps:$4 sm:$0xff]  }
 0x3b2   :  { %v2631_v55 = vmax.f32 %v2580_v47, 0.0  ;;  %v2633_v56 = vmax.f32 %v2623_v48, 0.0  ;;  %v5896_v36 = vld [vmem:[%s8010_s10 + $0x544] ss:$28 sps:$4 sm:$0xff]   ;;  %v5902_v40 = vld [vmem:[%s8010_s10 + $0x57c] ss:$28 sps:$4 sm:$0xff]  }
 0x3b3   :  { %v2632_v59 = vmax.f32 %v2582_v51, 0.0  ;;  %v2634_v63 = vmax.f32 %v2625_v52, 0.0  ;;  %v5897_v39 = vld [vmem:[%s8010_s10 + $0x548] ss:$28 sps:$4 sm:$0xff]   ;;  %v5903_v43 = vld [vmem:[%s8010_s10 + $0x580] ss:$28 sps:$4 sm:$0xff]  }
 0x3b4   :  { %v7447_v2 = vpack.c.bf16 %v2631_v55, %v2627_v53  ;;  %v7449_v3 = vpack.c.bf16 %v2633_v56, %v2629_v54  ;;  %v5908_v44 = vld [vmem:[%s8010_s10 + $0x5b4] ss:$28 sps:$4 sm:$0xff]   ;;  %v5911_v45 = vld [vmem:[%s8010_s10 + $0x5bc] ss:$28 sps:$4 sm:$0xff]   ;;  %v5914_v48 = vld [vmem:[%s8010_s10 + $0x5ec] ss:$28 sps:$4 sm:$0xff]  }
 0x3b5   :  { %v7451_v4 = vpack.c.bf16 %v2632_v59, %v2628_v57  ;;  %v7453_v5 = vpack.c.bf16 %v2634_v63, %v2630_v58  ;;  %v5906_v46 = vld [vmem:[%s8010_s10 + $0x5b0] ss:$28 sps:$4 sm:$0xff]   ;;  %v5909_v47 = vld [vmem:[%s8010_s10 + $0x5b8] ss:$28 sps:$4 sm:$0xff]   ;;  %v5912_v50 = vld [vmem:[%s8010_s10 + $0x5e8] ss:$28 sps:$4 sm:$0xff]  }
 0x3b6   :  { %v5917_v49 = vld [vmem:[%s8010_s10 + $0x5f4] ss:$28 sps:$4 sm:$0xff]   ;;  %v5920_v52 = vld [vmem:[%s8010_s10 + $0x624] ss:$28 sps:$4 sm:$0xff]   ;;  %v5923_v53 = vld [vmem:[%s8010_s10 + $0x62c] ss:$28 sps:$4 sm:$0xff]  }
 0x3b7   :  { %4116 = vmatprep.mubr.bf16.mxu0 %v7451_v4  ;;  %4202 = vmatprep.mubr.bf16.mxu1 %v7451_v4  ;;  %v5915_v51 = vld [vmem:[%s8010_s10 + $0x5f0] ss:$28 sps:$4 sm:$0xff]   ;;  %v5918_v54 = vld [vmem:[%s8010_s10 + $0x620] ss:$28 sps:$4 sm:$0xff]   ;;  %v5921_v55 = vld [vmem:[%s8010_s10 + $0x628] ss:$28 sps:$4 sm:$0xff]  }
 0x3b8   :  { %4117 = vmatmul.mubr.bf16.vlgmr.msra.gmra.mrb[12].mxu0 %v7447_v2  ;;  %4203 = vmatmul.mubr.bf16.vlgmr.msra.gmra.mrb[20].mxu1 %v7447_v2  ;;  %v5926_v56 = vld [vmem:[%s8010_s10 + $0x65c] ss:$28 sps:$4 sm:$0xff]   ;;  %v5929_v57 = vld [vmem:[%s8010_s10 + $0x664] ss:$28 sps:$4 sm:$0xff]   ;;  %v5932_v63 = vld [vmem:[%s8010_s10 + $0x694] ss:$28 sps:$4 sm:$0xff]  }
 0x3b9   :  { %4128 = vmatpush1.bf16.msra.mxu0 %v5846_v6  ;;  %4214 = vmatpush1.bf16.msra.mxu1 %v5849_v7  ;;  %v5924_v58 = vld [vmem:[%s8010_s10 + $0x658] ss:$28 sps:$4 sm:$0xff]   ;;  %v5927_v59 = vld [vmem:[%s8010_s10 + $0x660] ss:$28 sps:$4 sm:$0xff]   ;;  %v5930_v7 = vld [vmem:[%s8010_s10 + $0x690] ss:$28 sps:$4 sm:$0xff]  }
 0x3ba   :  { %4159 = vmatprep.mubr.bf16.mxu0 %v7453_v5  ;;  %4245 = vmatprep.mubr.bf16.mxu1 %v7453_v5  ;;  %v5935_v6 = vld [vmem:[%s8010_s10 + $0x69c] ss:$28 sps:$4 sm:$0xff]  }
 0x3bb   :  { %4129 = vmatprep.subr.bf16.mxu0 %v5854_v8  ;;  %4215 = vmatprep.subr.bf16.mxu1 %v5857_v9  ;;  %v5933_v8 = vld [vmem:[%s8010_s10 + $0x698] ss:$28 sps:$4 sm:$0xff]   ;;  %v5938_v9 = vld [vmem:[%s8010_s10 + $0x6cc] ss:$28 sps:$4 sm:$0xff]  }
 0x3bd   :  { %4130 = vmatpush1.bf16.msra.mxu0 %v5852_v10  ;;  %4216 = vmatpush1.bf16.msra.mxu1 %v5855_v24  ;;  %v5941_v10 = vld [vmem:[%s8010_s10 + $0x6d4] ss:$28 sps:$4 sm:$0xff]   ;;  %v5936_v24 = vld [vmem:[%s8010_s10 + $0x6c8] ss:$28 sps:$4 sm:$0xff]  }
 0x3be   :  { %4131 = vmatprep.subr.bf16.mxu0 %v5860_v11  ;;  %4217 = vmatprep.subr.bf16.mxu1 %v5863_v12  ;;  %v5939_v11 = vld [vmem:[%s8010_s10 + $0x6d0] ss:$28 sps:$4 sm:$0xff]  }
 0x3bf   :  { %v5944_v12 = vld [vmem:[%s8010_s10 + $0x14] ss:$28 sps:$4 sm:$0xff]  }
 0x3c1   :  { %4132 = vmatpush1.bf16.msra.mxu0 %v5858_v13  ;;  %4218 = vmatpush1.bf16.msra.mxu1 %v5861_v14  ;;  %v5945_v13 = vld [vmem:[%s8010_s10 + $0x1d8] ss:$28 sps:$4 sm:$0xff]   ;;  %v5942_v14 = vld [vmem:[%s8010_s10 + $0x10] ss:$28 sps:$4 sm:$0xff]  }
 0x3c2   :  { %4133 = vmatprep.subr.bf16.mxu0 %v5866_v15  ;;  %4219 = vmatprep.subr.bf16.mxu1 %v5869_v16  ;;  %v5946_v15 = vld [vmem:[%s8010_s10 + $0x18] ss:$28 sps:$4 sm:$0xff]   ;;  %v5949_v16 = vld [vmem:[%s8010_s10 + $0x4c] ss:$28 sps:$4 sm:$0xff]  }
 0x3c5   :  { %4134 = vmatpush1.bf16.msra.mxu0 %v5864_v17  ;;  %4220 = vmatpush1.bf16.msra.mxu1 %v5867_v18  ;;  %v5950_v17 = vld [vmem:[%s8010_s10 + $0x210] ss:$28 sps:$4 sm:$0xff]   ;;  %v5947_v18 = vld [vmem:[%s8010_s10 + $0x48] ss:$28 sps:$4 sm:$0xff]  }
 0x3c6   :  { %4135 = vmatprep.subr.bf16.mxu0 %v5872_v19  ;;  %4221 = vmatprep.subr.bf16.mxu1 %v5875_v20  ;;  %v5951_v19 = vld [vmem:[%s8010_s10 + $0x50] ss:$28 sps:$4 sm:$0xff]   ;;  %v5954_v20 = vld [vmem:[%s8010_s10 + $0x84] ss:$28 sps:$4 sm:$0xff]  }
 0x3c9   :  { %4136 = vmatpush1.bf16.msra.mxu0 %v5870_v21  ;;  %4222 = vmatpush1.bf16.msra.mxu1 %v5873_v22  ;;  %v5955_v21 = vld [vmem:[%s8010_s10 + $0x248] ss:$28 sps:$4 sm:$0xff]   ;;  %v5952_v22 = vld [vmem:[%s8010_s10 + $0x80] ss:$28 sps:$4 sm:$0xff]  }
 0x3ca   :  { %4137 = vmatprep.subr.bf16.mxu0 %v5878_v23  ;;  %4223 = vmatprep.subr.bf16.mxu1 %v5881_v25  ;;  %v5959_v23 = vld [vmem:[%s8010_s10 + $0xbc] ss:$28 sps:$4 sm:$0xff]  }
 0x3cb   :  { %v5960_v25 = vld [vmem:[%s8010_s10 + $0x280] ss:$28 sps:$4 sm:$0xff]  }
 0x3cd   :  { %4138 = vmatpush1.bf16.msra.mxu0 %v5876_v26  ;;  %4224 = vmatpush1.bf16.msra.mxu1 %v5879_v27  ;;  %v5957_v26 = vld [vmem:[%s8010_s10 + $0xb8] ss:$28 sps:$4 sm:$0xff]   ;;  %v5961_v27 = vld [vmem:[%s8010_s10 + $0xc0] ss:$28 sps:$4 sm:$0xff]  }
 0x3ce   :  { %4139 = vmatprep.subr.bf16.mxu0 %v5884_v28  ;;  %4225 = vmatprep.subr.bf16.mxu1 %v5887_v29  ;;  %v5964_v28 = vld [vmem:[%s8010_s10 + $0xf4] ss:$28 sps:$4 sm:$0xff]  }
 0x3cf   :  { %v5965_v29 = vld [vmem:[%s8010_s10 + $0x2b8] ss:$28 sps:$4 sm:$0xff]  }
 0x3d1   :  { %4140 = vmatpush1.bf16.msra.mxu0 %v5882_v30  ;;  %4226 = vmatpush1.bf16.msra.mxu1 %v5885_v31  ;;  %v5962_v30 = vld [vmem:[%s8010_s10 + $0xf0] ss:$28 sps:$4 sm:$0xff]   ;;  %v5966_v31 = vld [vmem:[%s8010_s10 + $0xf8] ss:$28 sps:$4 sm:$0xff]  }
 0x3d2   :  { %4141 = vmatprep.subr.bf16.mxu0 %v5890_v32  ;;  %4227 = vmatprep.subr.bf16.mxu1 %v5893_v33  ;;  %v5969_v32 = vld [vmem:[%s8010_s10 + $0x12c] ss:$28 sps:$4 sm:$0xff]  }
 0x3d3   :  { %v5970_v33 = vld [vmem:[%s8010_s10 + $0x2f0] ss:$28 sps:$4 sm:$0xff]  }
 0x3d5   :  { %4142 = vmatpush1.bf16.msra.mxu0 %v5888_v34  ;;  %4228 = vmatpush1.bf16.msra.mxu1 %v5891_v35  ;;  %v5967_v34 = vld [vmem:[%s8010_s10 + $0x128] ss:$28 sps:$4 sm:$0xff]   ;;  %v5971_v35 = vld [vmem:[%s8010_s10 + $0x130] ss:$28 sps:$4 sm:$0xff]  }
 0x3d6   :  { %4143 = vmatprep.subr.bf16.mxu0 %v5896_v36  ;;  %4229 = vmatprep.subr.bf16.mxu1 %v5899_v37  ;;  %v5974_v36 = vld [vmem:[%s8010_s10 + $0x164] ss:$28 sps:$4 sm:$0xff]  }
 0x3d7   :  { %v5975_v37 = vld [vmem:[%s8010_s10 + $0x328] ss:$28 sps:$4 sm:$0xff]  }
 0x3d9   :  { %4144 = vmatpush1.bf16.msra.mxu0 %v5894_v38  ;;  %4230 = vmatpush1.bf16.msra.mxu1 %v5897_v39  ;;  %v5972_v38 = vld [vmem:[%s8010_s10 + $0x160] ss:$28 sps:$4 sm:$0xff]   ;;  %v5976_v39 = vld [vmem:[%s8010_s10 + $0x168] ss:$28 sps:$4 sm:$0xff]  }
 0x3da   :  { %4145 = vmatprep.subr.bf16.mxu0 %v5902_v40  ;;  %4231 = vmatprep.subr.bf16.mxu1 %v5905_v41  ;;  %v5979_v40 = vld [vmem:[%s8010_s10 + $0x19c] ss:$28 sps:$4 sm:$0xff]  }
 0x3db   :  { %v5980_v41 = vld [vmem:[%s8010_s10 + $0x360] ss:$28 sps:$4 sm:$0xff]  }
 0x3dd   :  { %4146 = vmatpush1.bf16.msra.mxu0 %v5900_v42  ;;  %4232 = vmatpush1.bf16.msra.mxu1 %v5903_v43  ;;  %v5977_v42 = vld [vmem:[%s8010_s10 + $0x198] ss:$28 sps:$4 sm:$0xff]   ;;  %v5981_v43 = vld [vmem:[%s8010_s10 + $0x1a0] ss:$28 sps:$4 sm:$0xff]  }
 0x3de   :  { %4147 = vmatprep.subr.bf16.mxu0 %v5908_v44  ;;  %4233 = vmatprep.subr.bf16.mxu1 %v5911_v45  ;;  %v5984_v44 = vld [vmem:[%s8010_s10 + $0x1d4] ss:$28 sps:$4 sm:$0xff]  }
 0x3df   :  { %v5985_v45 = vld [vmem:[%s8010_s10 + $0x558] ss:$28 sps:$4 sm:$0xff]  }
 0x3e1   :  { %4148 = vmatpush1.bf16.msra.mxu0 %v5906_v46  ;;  %4234 = vmatpush1.bf16.msra.mxu1 %v5909_v47  ;;  %v5982_v46 = vld [vmem:[%s8010_s10 + $0x1d0] ss:$28 sps:$4 sm:$0xff]   ;;  %v5986_v47 = vld [vmem:[%s8010_s10 + $0x398] ss:$28 sps:$4 sm:$0xff]  }
 0x3e2   :  { %4149 = vmatprep.subr.bf16.mxu0 %v5914_v48  ;;  %4235 = vmatprep.subr.bf16.mxu1 %v5917_v49  ;;  %v5989_v48 = vld [vmem:[%s8010_s10 + $0x20c] ss:$28 sps:$4 sm:$0xff]  }
 0x3e3   :  { %v5990_v49 = vld [vmem:[%s8010_s10 + $0x590] ss:$28 sps:$4 sm:$0xff]  }
 0x3e5   :  { %4150 = vmatpush1.bf16.msra.mxu0 %v5912_v50  ;;  %4236 = vmatpush1.bf16.msra.mxu1 %v5915_v51  ;;  %v5987_v50 = vld [vmem:[%s8010_s10 + $0x208] ss:$28 sps:$4 sm:$0xff]   ;;  %v5991_v51 = vld [vmem:[%s8010_s10 + $0x3d0] ss:$28 sps:$4 sm:$0xff]  }
 0x3e6   :  { %4151 = vmatprep.subr.bf16.mxu0 %v5920_v52  ;;  %4237 = vmatprep.subr.bf16.mxu1 %v5923_v53  ;;  %v5994_v52 = vld [vmem:[%s8010_s10 + $0x244] ss:$28 sps:$4 sm:$0xff]  }
 0x3e7   :  { %v5995_v53 = vld [vmem:[%s8010_s10 + $0x5c8] ss:$28 sps:$4 sm:$0xff]  }
 0x3e9   :  { %4152 = vmatpush1.bf16.msra.mxu0 %v5918_v54  ;;  %4238 = vmatpush1.bf16.msra.mxu1 %v5921_v55  ;;  %v5992_v54 = vld [vmem:[%s8010_s10 + $0x240] ss:$28 sps:$4 sm:$0xff]   ;;  %v5996_v55 = vld [vmem:[%s8010_s10 + $0x408] ss:$28 sps:$4 sm:$0xff]  }
 0x3ea   :  { %4153 = vmatprep.subr.bf16.mxu0 %v5926_v56  ;;  %4239 = vmatprep.subr.bf16.mxu1 %v5929_v57  ;;  %v5999_v56 = vld [vmem:[%s8010_s10 + $0x27c] ss:$28 sps:$4 sm:$0xff]  }
 0x3eb   :  { %v6000_v57 = vld [vmem:[%s8010_s10 + $0x600] ss:$28 sps:$4 sm:$0xff]  }
 0x3ed   :  { %4154 = vmatpush1.bf16.msra.mxu0 %v5924_v58  ;;  %4240 = vmatpush1.bf16.msra.mxu1 %v5927_v59  ;;  %v5997_v58 = vld [vmem:[%s8010_s10 + $0x278] ss:$28 sps:$4 sm:$0xff]   ;;  %v6001_v59 = vld [vmem:[%s8010_s10 + $0x440] ss:$28 sps:$4 sm:$0xff]  }
 0x3ee   :  { %4155 = vmatprep.subr.bf16.mxu0 %v5932_v63  ;;  %4241 = vmatprep.subr.bf16.mxu1 %v5935_v6  ;;  %v6004_v63 = vld [vmem:[%s8010_s10 + $0x2b4] ss:$28 sps:$4 sm:$0xff]  }
 0x3ef   :  { %v6005_v6 = vld [vmem:[%s8010_s10 + $0x638] ss:$28 sps:$4 sm:$0xff]  }
 0x3f1   :  { %4156 = vmatpush1.bf16.msra.mxu0 %v5930_v7  ;;  %4242 = vmatpush1.bf16.msra.mxu1 %v5933_v8  ;;  %v6002_v7 = vld [vmem:[%s8010_s10 + $0x2b0] ss:$28 sps:$4 sm:$0xff]   ;;  %v6006_v8 = vld [vmem:[%s8010_s10 + $0x478] ss:$28 sps:$4 sm:$0xff]  }
 0x3f2   :  { %4157 = vmatprep.subr.bf16.mxu0 %v5938_v9  ;;  %4243 = vmatprep.subr.bf16.mxu1 %v5941_v10  ;;  %v6009_v9 = vld [vmem:[%s8010_s10 + $0x2ec] ss:$28 sps:$4 sm:$0xff]  }
 0x3f3   :  { %v6010_v10 = vld [vmem:[%s8010_s10 + $0x670] ss:$28 sps:$4 sm:$0xff]  }
 0x3f5   :  { %4158 = vmatpush1.bf16.msra.mxu0 %v5936_v24  ;;  %4244 = vmatpush1.bf16.msra.mxu1 %v5939_v11  ;;  %v6007_v24 = vld [vmem:[%s8010_s10 + $0x2e8] ss:$28 sps:$4 sm:$0xff]   ;;  %v6011_v11 = vld [vmem:[%s8010_s10 + $0x4b0] ss:$28 sps:$4 sm:$0xff]  }
 0x3f6   :  { %4256 = vmatprep.subr.bf16.mxu0 %v5944_v12  ;;  %5236 = vmatprep.subr.bf16.mxu1 %v5945_v13  ;;  %v6014_v12 = vld [vmem:[%s8010_s10 + $0x324] ss:$28 sps:$4 sm:$0xff]  }
 0x3f7   :  { %v6015_v13 = vld [vmem:[%s8010_s10 + $0x6a8] ss:$28 sps:$4 sm:$0xff]  }
 0x3f8   :  { %4160 = vmatmul.mubr.bf16.vlgmr.msra.gmra.mrb[12].mxu0 %v7449_v3  ;;  %4246 = vmatmul.mubr.bf16.vlgmr.msra.gmra.mrb[20].mxu1 %v7449_v3 }
 0x3f9   :  { %4257 = vmatpush1.bf16.msra.mxu0 %v5942_v14  ;;  %4288 = vmatprep.mubr.bf16.mxu0 %v7451_v4  ;;  %v6012_v14 = vld [vmem:[%s8010_s10 + $0x320] ss:$28 sps:$4 sm:$0xff]  }
 0x3fa   :  { %5237 = vmatpush3.bf16.msra.mxu1 %v5946_v15  ;;  %4374 = vmatprep.mubr.bf16.mxu1 %v7451_v4  ;;  %v5956_v4 = vld [vmem:[%s8010_s10 + $0x88] ss:$28 sps:$4 sm:$0xff]  }
 0x3fb   :  { %4258 = vmatprep.subr.bf16.mxu0 %v5949_v16  ;;  %5238 = vmatprep.subr.bf16.mxu1 %v5950_v17  ;;  %v6016_v15 = vld [vmem:[%s8010_s10 + $0x4e8] ss:$28 sps:$4 sm:$0xff]   ;;  %v6019_v16 = vld [vmem:[%s8010_s10 + $0x35c] ss:$28 sps:$4 sm:$0xff]  }
 0x3fc   :  { %v6020_v17 = vld [vmem:[%s8010_s10 + $0x6e0] ss:$28 sps:$4 sm:$0xff]  }
 0x3fd   :  { %4259 = vmatpush1.bf16.msra.mxu0 %v5947_v18  ;;  %v6017_v18 = vld [vmem:[%s8010_s10 + $0x358] ss:$28 sps:$4 sm:$0xff]  }
 0x3fe   :  { %5239 = vmatpush3.bf16.msra.mxu1 %v5951_v19  ;;  %4260 = vmatprep.subr.bf16.mxu0 %v5954_v20  ;;  %v6021_v19 = vld [vmem:[%s8010_s10 + $0x520] ss:$28 sps:$4 sm:$0xff]   ;;  %v6024_v20 = vld [vmem:[%s8010_s10 + $0x394] ss:$28 sps:$4 sm:$0xff]  }
 0x3ff   :  { %5240 = vmatprep.subr.bf16.mxu1 %v5955_v21  ;;  %v6022_v21 = vld [vmem:[%s8010_s10 + $0x390] ss:$28 sps:$4 sm:$0xff]  }
 0x401   :  { %4261 = vmatpush1.bf16.msra.mxu0 %v5952_v22  ;;  %v6027_v22 = vld [vmem:[%s8010_s10 + $0x3cc] ss:$28 sps:$4 sm:$0xff]  }
 0x402   :  { %5241 = vmatpush3.bf16.msra.mxu1 %v5956_v4  ;;  %4262 = vmatprep.subr.bf16.mxu0 %v5959_v23  ;;  %v6025_v4 = vld [vmem:[%s8010_s10 + $0x3c8] ss:$28 sps:$4 sm:$0xff]  }
 0x403   :  { %5242 = vmatprep.subr.bf16.mxu1 %v5960_v25  ;;  %v6030_v23 = vld [vmem:[%s8010_s10 + $0x404] ss:$28 sps:$4 sm:$0xff]  }
 0x404   :  { %v6028_v25 = vld [vmem:[%s8010_s10 + $0x400] ss:$28 sps:$4 sm:$0xff]  }
 0x405   :  { %4263 = vmatpush1.bf16.msra.mxu0 %v5957_v26  ;;  %v6036_v26 = vld [vmem:[%s8010_s10 + $0x474] ss:$28 sps:$4 sm:$0xff]  }
 0x406   :  { %5243 = vmatpush3.bf16.msra.mxu1 %v5961_v27  ;;  %4264 = vmatprep.subr.bf16.mxu0 %v5964_v28  ;;  %v6034_v27 = vld [vmem:[%s8010_s10 + $0x470] ss:$28 sps:$4 sm:$0xff]  }
 0x407   :  { %5244 = vmatprep.subr.bf16.mxu1 %v5965_v29  ;;  %v6039_v28 = vld [vmem:[%s8010_s10 + $0x4ac] ss:$28 sps:$4 sm:$0xff]  }
 0x408   :  { %v6037_v29 = vld [vmem:[%s8010_s10 + $0x4a8] ss:$28 sps:$4 sm:$0xff]  }
 0x409   :  { %4265 = vmatpush1.bf16.msra.mxu0 %v5962_v30  ;;  %v6042_v30 = vld [vmem:[%s8010_s10 + $0x4e4] ss:$28 sps:$4 sm:$0xff]  }
 0x40a   :  { %5245 = vmatpush3.bf16.msra.mxu1 %v5966_v31  ;;  %4266 = vmatprep.subr.bf16.mxu0 %v5969_v32  ;;  %v6040_v31 = vld [vmem:[%s8010_s10 + $0x4e0] ss:$28 sps:$4 sm:$0xff]  }
 0x40b   :  { %5246 = vmatprep.subr.bf16.mxu1 %v5970_v33  ;;  %v6045_v32 = vld [vmem:[%s8010_s10 + $0x51c] ss:$28 sps:$4 sm:$0xff]  }
 0x40c   :  { %v6043_v33 = vld [vmem:[%s8010_s10 + $0x518] ss:$28 sps:$4 sm:$0xff]  }
 0x40d   :  { %4267 = vmatpush1.bf16.msra.mxu0 %v5967_v34  ;;  %v6048_v34 = vld [vmem:[%s8010_s10 + $0x554] ss:$28 sps:$4 sm:$0xff]  }
 0x40e   :  { %5247 = vmatpush3.bf16.msra.mxu1 %v5971_v35  ;;  %4268 = vmatprep.subr.bf16.mxu0 %v5974_v36  ;;  %v6046_v35 = vld [vmem:[%s8010_s10 + $0x550] ss:$28 sps:$4 sm:$0xff]  }
 0x40f   :  { %5248 = vmatprep.subr.bf16.mxu1 %v5975_v37  ;;  %v6051_v36 = vld [vmem:[%s8010_s10 + $0x58c] ss:$28 sps:$4 sm:$0xff]  }
 0x410   :  { %v6049_v37 = vld [vmem:[%s8010_s10 + $0x588] ss:$28 sps:$4 sm:$0xff]  }
 0x411   :  { %4269 = vmatpush1.bf16.msra.mxu0 %v5972_v38  ;;  %v6054_v38 = vld [vmem:[%s8010_s10 + $0x5c4] ss:$28 sps:$4 sm:$0xff]  }
 0x412   :  { %5249 = vmatpush3.bf16.msra.mxu1 %v5976_v39  ;;  %4270 = vmatprep.subr.bf16.mxu0 %v5979_v40  ;;  %v6052_v39 = vld [vmem:[%s8010_s10 + $0x5c0] ss:$28 sps:$4 sm:$0xff]  }
 0x413   :  { %5250 = vmatprep.subr.bf16.mxu1 %v5980_v41  ;;  %v6057_v40 = vld [vmem:[%s8010_s10 + $0x5fc] ss:$28 sps:$4 sm:$0xff]  }
 0x414   :  { %v6055_v41 = vld [vmem:[%s8010_s10 + $0x5f8] ss:$28 sps:$4 sm:$0xff]  }
 0x415   :  { %4271 = vmatpush1.bf16.msra.mxu0 %v5977_v42  ;;  %v6060_v42 = vld [vmem:[%s8010_s10 + $0x634] ss:$28 sps:$4 sm:$0xff]  }
 0x416   :  { %5251 = vmatpush3.bf16.msra.mxu1 %v5981_v43  ;;  %4272 = vmatprep.subr.bf16.mxu0 %v5984_v44  ;;  %v6058_v43 = vld [vmem:[%s8010_s10 + $0x630] ss:$28 sps:$4 sm:$0xff]  }
 0x417   :  { %5258 = vmatprep.subr.bf16.mxu1 %v5985_v45  ;;  %v6063_v44 = vld [vmem:[%s8010_s10 + $0x66c] ss:$28 sps:$4 sm:$0xff]  }
 0x418   :  { %v6061_v45 = vld [vmem:[%s8010_s10 + $0x668] ss:$28 sps:$4 sm:$0xff]  }
 0x419   :  { %4375 = vmatmul.mubr.bf16.vlgmr.msra.gmra.mrb[24].mxu1 %v7447_v2  ;;  %4273 = vmatpush1.bf16.msra.mxu0 %v5982_v46  ;;  %v6066_v46 = vld [vmem:[%s8010_s10 + $0x6a4] ss:$28 sps:$4 sm:$0xff]  }
 0x41a   :  { %5259 = vmatpush3.bf16.msra.mxu1 %v5986_v47  ;;  %4415 = vmatprep.mubr.bf16.mxu1 %v7453_v5  ;;  %v6064_v47 = vld [vmem:[%s8010_s10 + $0x6a0] ss:$28 sps:$4 sm:$0xff]  }
 0x41b   :  { %4274 = vmatprep.subr.bf16.mxu0 %v5989_v48  ;;  %5260 = vmatprep.subr.bf16.mxu1 %v5990_v49  ;;  %v6069_v48 = vld [vmem:[%s8010_s10 + $0x6dc] ss:$28 sps:$4 sm:$0xff]  }
 0x41c   :  { %v6067_v49 = vld [vmem:[%s8010_s10 + $0x6d8] ss:$28 sps:$4 sm:$0xff]  }
 0x41d   :  { %4275 = vmatpush1.bf16.msra.mxu0 %v5987_v50  ;;  %v7948_v50 = vld [vmem:[%s8011_s11] sm:$0x7f] }
 0x41e   :  { %5261 = vmatpush3.bf16.msra.mxu1 %v5991_v51  ;;  %4276 = vmatprep.subr.bf16.mxu0 %v5994_v52  ;;  %v2900_v51 = vrot.slane %v7948_v50, %v7017_v61  ;;  %v2908_v52 = vrot.slane %v7948_v50, %v7020_v62 }
 0x41f   :  { %5262 = vmatprep.subr.bf16.mxu1 %v5995_v53  ;;  %v2904_v53 = vrot.slane %v7948_v50, %v7026_v0 }
 0x421   :  { %4277 = vmatpush1.bf16.msra.mxu0 %v5992_v54  ;;  %v2912_v54 = vrot.slane %v7948_v50, %v7029_v1 }
 0x422   :  { %5263 = vmatpush3.bf16.msra.mxu1 %v5996_v55  ;;  %4278 = vmatprep.subr.bf16.mxu0 %v5999_v56 }
 0x423   :  { %5264 = vmatprep.subr.bf16.mxu1 %v6000_v57 }
 0x425   :  { %4279 = vmatpush1.bf16.msra.mxu0 %v5997_v58 }
 0x426   :  { %5265 = vmatpush3.bf16.msra.mxu1 %v6001_v59  ;;  %4280 = vmatprep.subr.bf16.mxu0 %v6004_v63 }
 0x427   :  { %5266 = vmatprep.subr.bf16.mxu1 %v6005_v6 }
 0x429   :  { %4281 = vmatpush1.bf16.msra.mxu0 %v6002_v7 }
 0x42a   :  { %5267 = vmatpush3.bf16.msra.mxu1 %v6006_v8  ;;  %4282 = vmatprep.subr.bf16.mxu0 %v6009_v9 }
 0x42b   :  { %5268 = vmatprep.subr.bf16.mxu1 %v6010_v10 }
 0x42d   :  { %4283 = vmatpush1.bf16.msra.mxu0 %v6007_v24 }
 0x42e   :  { %5269 = vmatpush3.bf16.msra.mxu1 %v6011_v11  ;;  %4284 = vmatprep.subr.bf16.mxu0 %v6014_v12 }
 0x42f   :  { %5270 = vmatprep.subr.bf16.mxu1 %v6015_v13 }
 0x431   :  { %4285 = vmatpush1.bf16.msra.mxu0 %v6012_v14 }
 0x432   :  { %5271 = vmatpush3.bf16.msra.mxu1 %v6016_v15  ;;  %4286 = vmatprep.subr.bf16.mxu0 %v6019_v16 }
 0x433   :  { %5272 = vmatprep.subr.bf16.mxu1 %v6020_v17 }
 0x435   :  { %4287 = vmatpush1.bf16.msra.mxu0 %v6017_v18 }
 0x436   :  { %5273 = vmatpush3.bf16.msra.mxu1 %v6021_v19  ;;  %4299 = vmatprep.subr.bf16.mxu0 %v6024_v20 }
 0x438   :  { %4289 = vmatmul.mubr.bf16.vlgmr.msra.gmra.mrb[16].mxu0 %v7447_v2  ;;  %v6033_v2 = vld [vmem:[%s8010_s10 + $0x43c] ss:$28 sps:$4 sm:$0xff]  }
 0x439   :  { %4416 = vmatmul.mubr.bf16.vlgmr.msra.gmra.mrb[28].mxu1 %v7449_v3  ;;  %4300 = vmatpush1.bf16.msra.mxu0 %v6022_v21 }
 0x43a   :  { %4331 = vmatprep.mubr.bf16.mxu0 %v7453_v5  ;;  %4301 = vmatprep.subr.bf16.mxu0 %v6027_v22  ;;  %v6031_v5 = vld [vmem:[%s8010_s10 + $0x438] ss:$28 sps:$4 sm:$0xff]   ;;  %s6201_s10 = smov [#allocation4]  }
 0x43b   :  { %s4582_s11 = sshll.u32 %s6201_s10, 4  ;;  %s4583_s11 = int_to_ptr.vmem [resolvable:$true] %s4582_s11 }
 0x43c   :  { %s6130_s29 = scalar_lea.vmem %s4583_s11, 256  ;;  %p6135_p1 = scmp.lt.s32.totalorder %s4583_s11, %s4583_s11 }
 0x43d   :  { %4302 = vmatpush1.bf16.msra.mxu0 %v6025_v4  ;;  %p6131_p0 = scmp.ne.s32.totalorder %s4583_s11, %s6130_s29  ;;  %p6136_p2 = scmp.lt.s32.totalorder %s6130_s29, %s6130_s29 }
 0x43e   :  { %4303 = vmatprep.subr.bf16.mxu0 %v6030_v23 }
 0x43f   :  { %p6137_p3 = por %p6136_p2, %p6135_p1 }
 0x441   :  { %4304 = vmatpush1.bf16.msra.mxu0 %v6028_v25  ;;  %p6138_p4 = pnand %p6137_p3, %p6131_p0 }
 0x442   :  { %4305 = vmatprep.subr.bf16.mxu0 %v6033_v2 }
 0x445   :  { %4306 = vmatpush1.bf16.msra.mxu0 %v6031_v5 }
 0x446   :  { %4307 = vmatprep.subr.bf16.mxu0 %v6036_v26 }
 0x449   :  { %4308 = vmatpush1.bf16.msra.mxu0 %v6034_v27 }
 0x44a   :  { %4309 = vmatprep.subr.bf16.mxu0 %v6039_v28 }
 0x44d   :  { %4310 = vmatpush1.bf16.msra.mxu0 %v6037_v29 }
 0x44e   :  { %4311 = vmatprep.subr.bf16.mxu0 %v6042_v30 }
 0x451   :  { %4312 = vmatpush1.bf16.msra.mxu0 %v6040_v31 }
 0x452   :  { %4313 = vmatprep.subr.bf16.mxu0 %v6045_v32 }
 0x455   :  { %4314 = vmatpush1.bf16.msra.mxu0 %v6043_v33 }
 0x456   :  { %4315 = vmatprep.subr.bf16.mxu0 %v6048_v34 }
 0x459   :  { %4316 = vmatpush1.bf16.msra.mxu0 %v6046_v35 }
 0x45a   :  { %4317 = vmatprep.subr.bf16.mxu0 %v6051_v36 }
 0x45d   :  { %4318 = vmatpush1.bf16.msra.mxu0 %v6049_v37 }
 0x45e   :  { %4319 = vmatprep.subr.bf16.mxu0 %v6054_v38 }
 0x461   :  { %4320 = vmatpush1.bf16.msra.mxu0 %v6052_v39 }
 0x462   :  { %4321 = vmatprep.subr.bf16.mxu0 %v6057_v40 }
 0x465   :  { %4322 = vmatpush1.bf16.msra.mxu0 %v6055_v41 }
 0x466   :  { %4323 = vmatprep.subr.bf16.mxu0 %v6060_v42 }
 0x469   :  { %4324 = vmatpush1.bf16.msra.mxu0 %v6058_v43 }
 0x46a   :  { %4325 = vmatprep.subr.bf16.mxu0 %v6063_v44 }
 0x46d   :  { %4326 = vmatpush1.bf16.msra.mxu0 %v6061_v45 }
 0x46e   :  { %4327 = vmatprep.subr.bf16.mxu0 %v6066_v46 }
 0x471   :  { %4328 = vmatpush1.bf16.msra.mxu0 %v6064_v47 }
 0x472   :  { %4329 = vmatprep.subr.bf16.mxu0 %v6069_v48 }
 0x475   :  { %4330 = vmatpush1.bf16.msra.mxu0 %v6067_v49 }
 0x478   :  { %4332 = vmatmul.mubr.bf16.vlgmr.msra.gmra.mrb[16].mxu0 %v7449_v3 }
 0x4cb   :  { %v4161_v55 = vpop.f32.mrb[12].mxu0  ;;  %v4247_v56 = vpop.f32.mrb[20].mxu1 }
 0x4cc   :  { %v5288_v3 = vadd.f32 %v4161_v55, %v2900_v51  ;;  %v5292_v57 = vadd.f32 %v4247_v56, %v2908_v52  ;;  %v4163_v58 = vpop.f32.mrb[13].mxu0  ;;  %v4249_v59 = vpop.f32.mrb[21].mxu1 }
 0x4cd   :  { %v5289_v63 = vadd.f32 %v4163_v58, %v2904_v53  ;;  %v5293_v6 = vadd.f32 %v4249_v59, %v2912_v54  ;;  %v4165_v7 = vpop.f32.mrb[14].mxu0  ;;  %v4251_v8 = vpop.f32.mrb[22].mxu1 }
 0x4ce   :  { %v4424_v61 = vsub.f32 0.0, %v5288_v3  ;;  %v4426_v9 = vsub.f32 0.0, %v5292_v57  ;;  %v5290_v10 = vadd.f32 %v4165_v7, %v2900_v51  ;;  %v5294_v62 = vadd.f32 %v4251_v8, %v2908_v52  ;;  %v4167_v24 = vpop.f32.mrb[15].mxu0  ;;  %v4253_v11 = vpop.f32.mrb[23].mxu1 }
 0x4cf   :  { %v4425_v0 = vsub.f32 0.0, %v5289_v63  ;;  %v4427_v12 = vsub.f32 0.0, %v5293_v6  ;;  %v5291_v13 = vadd.f32 %v4167_v24, %v2904_v53  ;;  %v5295_v1 = vadd.f32 %v4253_v11, %v2912_v54 }
 0x4d0   :  { %v4438_v14 = vmul.f32 1.442695, %v4424_v61  ;;  %v4442_v15 = vmul.f32 1.442695, %v4426_v9  ;;  %v4431_v16 = vsub.f32 0.0, %v5290_v10  ;;  %v4433_v17 = vsub.f32 0.0, %v5294_v62 }
 0x4d1   :  { %v4440_v18 = vmul.f32 1.442695, %v4425_v0  ;;  %v4444_v19 = vmul.f32 1.442695, %v4427_v12  ;;  %v4432_v20 = vsub.f32 0.0, %v5291_v13  ;;  %v4434_v21 = vsub.f32 0.0, %v5295_v1 }
 0x4d2   :  { %6074 = vpow2.f32 %v4438_v14  ;;  %v4452_v22 = vmul.f32 1.442695, %v4431_v16  ;;  %v4456_v4 = vmul.f32 1.442695, %v4433_v17 }
 0x4d3   :  { %6076 = vpow2.f32 %v4442_v15  ;;  %v4454_v23 = vmul.f32 1.442695, %v4432_v20  ;;  %v4458_v25 = vmul.f32 1.442695, %v4434_v21 }
 0x4d4   :  { %6078 = vpow2.f32 %v4440_v18 }
 0x4d5   :  { %6080 = vpow2.f32 %v4444_v19 }
 0x4d6   :  { %6082 = vpow2.f32 %v4452_v22 }
 0x4d7   :  { %6084 = vpow2.f32 %v4456_v4 }
 0x4d8   :  { %6086 = vpow2.f32 %v4454_v23 }
 0x4d9   :  { %6088 = vpow2.f32 %v4458_v25 }
 0x4dc   :  { %v6075_v2 = vpop.eup %6074 }
 0x4dd   :  { %v6077_v5 = vpop.eup %6076  ;;  %v4466_v26 = vadd.f32 1.0, %v6075_v2 }
 0x4de   :  { %v6079_v27 = vpop.eup %6078  ;;  %v4468_v28 = vadd.f32 1.0, %v6077_v5 }
 0x4df   :  { %v6081_v29 = vpop.eup %6080  ;;  %6090 = vrcp.f32 %v4466_v26  ;;  %v4467_v30 = vadd.f32 1.0, %v6079_v27 }
 0x4e0   :  { %v6083_v31 = vpop.eup %6082  ;;  %6092 = vrcp.f32 %v4468_v28  ;;  %v4469_v32 = vadd.f32 1.0, %v6081_v29 }
 0x4e1   :  { %v6085_v33 = vpop.eup %6084  ;;  %6094 = vrcp.f32 %v4467_v30  ;;  %v4473_v34 = vadd.f32 1.0, %v6083_v31 }
 0x4e2   :  { %v6087_v35 = vpop.eup %6086  ;;  %6096 = vrcp.f32 %v4469_v32  ;;  %v4475_v36 = vadd.f32 1.0, %v6085_v33 }
 0x4e3   :  { %v6089_v37 = vpop.eup %6088  ;;  %6098 = vrcp.f32 %v4473_v34  ;;  %v4474_v38 = vadd.f32 1.0, %v6087_v35 }
 0x4e4   :  { %6100 = vrcp.f32 %v4475_v36  ;;  %v4476_v39 = vadd.f32 1.0, %v6089_v37 }
 0x4e5   :  { %6102 = vrcp.f32 %v4474_v38 }
 0x4e6   :  { %6104 = vrcp.f32 %v4476_v39 }
 0x4e9   :  { %v6091_v40 = vpop.eup %6090 }
 0x4ea   :  { %v6093_v41 = vpop.eup %6092 }
 0x4eb   :  { %v6095_v42 = vpop.eup %6094 }
 0x4ec   :  { %v6097_v43 = vpop.eup %6096  ;;  %v5140_v44 = vpack.c.bf16 %v6095_v42, %v6091_v40  ;;  %v5252_v45 = vpop.f32.mrb[24].mxu1 }
 0x4ed   :  { %v6099_v46 = vpop.eup %6098  ;;  %v5141_v47 = vpack.c.bf16 %v6097_v43, %v6093_v41  ;;  %v5253_v48 = vpop.f32.mrb[25].mxu1 }
 0x4ee   :  { %v6101_v49 = vpop.eup %6100  ;;  %4552 = vst [vmem:[#allocation2] sm:$0xff] %v5140_v44  ;;  %v5254_v51 = vadd.f32 %v5253_v48, %v5252_v45  ;;  %v5255_v52 = vpop.f32.mrb[26].mxu1 }
 0x4ef   :  { %v6103_v53 = vpop.eup %6102  ;;  %4553 = vst [vmem:[#allocation2 + $0x8] sm:$0xff] %v5141_v47  ;;  %v5256_v54 = vpop.f32.mrb[27].mxu1 }
 0x4f0   :  { %v6105_v55 = vpop.eup %6104  ;;  %v5144_v56 = vpack.c.bf16 %v6103_v53, %v6099_v46  ;;  %v5257_v3 = vadd.f32 %v5256_v54, %v5255_v52 }
 0x4f1   :  { %v5145_v57 = vpack.c.bf16 %v6105_v55, %v6101_v49 }
 0x4f2   :  { %4557 = vst [vmem:[#allocation2 + $0x1c] sm:$0xff] %v5144_v56 }
 0x4f3   :  { %6141 = shalt.err (!%p6138_p4)
}
 0x4f4   :  { %s6142_s16 = scalar_lea.hbm %s8013_s13, 256 }
 0x4f5   :  { %p6143_p5 = scmp.ne.s32.totalorder %s8013_s13, %s6142_s16  ;;  %p6146_p6 = scmp.lt.u32.totalorder %s6142_s16, %s8013_s13 }
 0x4f7   :  { %p6148_p7 = pnand %p6146_p6, %p6143_p5 }
 0x4f9   :  { %6151 = shalt.err (!%p6148_p7)
}
 0x4fa   :  { %s6202_s19 = smov 128   ;;  %s6203_s20 = smov 8   ;;  %4558 = vst [vmem:[#allocation2 + $0x24] sm:$0xff] %v5145_v57 }
 0x4fb   :  { %4588 = dma.vmem_to_hbm [thread:$0]  %s4583_s11, 256, %s8013_s13, [#allocation5], %s6202_s19, %s6202_s19, %s6203_s20  }
 0x4fc   :  { %s6204_s21 = smov [#allocation6]  }
 0x4fd   :  { %s4594_s7 = sshll.u32 %s6204_s21, 4  ;;  %s4595_s7 = int_to_ptr.vmem [resolvable:$true] %s4594_s7 }
 0x4fe   :  { %s6152_s22 = scalar_lea.vmem %s4595_s7, 256  ;;  %p6157_p9 = scmp.lt.s32.totalorder %s4595_s7, %s4595_s7 }
 0x4ff   :  { %p6153_p8 = scmp.ne.s32.totalorder %s4595_s7, %s6152_s22  ;;  %p6158_p10 = scmp.lt.s32.totalorder %s6152_s22, %s6152_s22 }
 0x501   :  { %p6159_p11 = por %p6158_p10, %p6157_p9 }
 0x503   :  { %p6160_p12 = pnand %p6159_p11, %p6153_p8 }
 0x505   :  { %6163 = shalt.err (!%p6160_p12)
}
 0x506   :  { %s6164_s25 = scalar_lea.hbm %s8014_s14, 256 }
 0x507   :  { %p6165_p13 = scmp.ne.s32.totalorder %s8014_s14, %s6164_s25  ;;  %p6168_p0 = scmp.lt.u32.totalorder %s6164_s25, %s8014_s14 }
 0x509   :  { %p6170_p1 = pnand %p6168_p0, %p6165_p13 }
 0x50b   :  { %6173 = shalt.err (!%p6170_p1)
}
 0x50c   :  { %4600 = dma.vmem_to_hbm [thread:$0]  %s4595_s7, 256, %s8014_s14, [#allocation5], %s6202_s19, %s6202_s19, %s6203_s20   ;;  %v2923_v58 = vsub.s32 6, %v7014_v60  ;;  %v5274_v63 = vpop.f32.mrb[28].mxu1  ;;  %vm4555_vm1 = vcmask 125952   ;;  %v2915_v22 = vsub.s32 4, %v7014_v60 }
 0x50d   :  { %v5275_v6 = vpop.f32.mrb[29].mxu1  ;;  %v2919_v4 = vsub.s32 5, %v7014_v60  ;;  %s6205_s14 = smov [#allocation2]  }
 0x50e   :  { %v2924_v59 = vrot.slane %v7948_v50, %v2923_v58  ;;  %v5276_v8 = vadd.f32 %v5275_v6, %v5274_v63  ;;  %v5277_v61 = vpop.f32.mrb[30].mxu1  ;;  %v2916_v23 = vrot.slane %v7948_v50, %v2915_v22  ;;  %s4570_s0 = sshll.u32 %s6205_s14, 4  ;;  %s4571_s0 = int_to_ptr.vmem [resolvable:$true] %s4570_s0 }
 0x50f   :  { %v5278_v9 = vpop.f32.mrb[31].mxu1  ;;  %v2920_v25 = vrot.slane %v7948_v50, %v2919_v4  ;;  %s6174_s28 = scalar_lea.vmem %s4571_s0, 896  ;;  %p6179_p3 = scmp.lt.s32.totalorder %s4571_s0, %s4571_s0 }
 0x510   :  { %v4377_v7 = vadd.f32 %v5254_v51, %v2924_v59  ;;  %v4380_v10 = vadd.f32 %v5257_v3, %v2924_v59  ;;  %v5279_v24 = vadd.f32 %v5278_v9, %v5277_v61  ;;  %p6175_p2 = scmp.ne.s32.totalorder %s4571_s0, %s6174_s28  ;;  %p6180_p4 = scmp.lt.s32.totalorder %s6174_s28, %s6174_s28 }
 0x512   :  { %v4418_v62 = vadd.f32 %v5276_v8, %v4377_v7  ;;  %v4421_v0 = vadd.f32 %v5279_v24, %v4380_v10  ;;  %p6181_p5 = por %p6180_p4, %p6179_p3 }
 0x514   :  { %v4430_v11 = vsub.f32 0.0, %v4418_v62  ;;  %v4437_v13 = vsub.f32 0.0, %v4421_v0  ;;  %p6182_p6 = pnand %p6181_p5, %p6175_p2 }
 0x516   :  { %v4450_v12 = vmul.f32 1.442695, %v4430_v11  ;;  %v4464_v1 = vmul.f32 1.442695, %v4437_v13 }
 0x518   :  { %6106 = vpow2.f32 %v4450_v12 }
 0x519   :  { %6108 = vpow2.f32 %v4464_v1 }
 0x522   :  { %v6107_v14 = vpop.eup %6106 }
 0x523   :  { %v4472_v15 = vadd.f32 1.0, %v6107_v14  ;;  %v6109_v16 = vpop.eup %6108 }
 0x524   :  { %v4479_v17 = vadd.f32 1.0, %v6109_v16 }
 0x525   :  { %6110 = vrcp.f32 %v4472_v15 }
 0x526   :  { %6112 = vrcp.f32 %v4479_v17 }
 0x52f   :  { %v6111_v18 = vpop.eup %6110 }
 0x530   :  { %v5143_v19 = vpack.c.bf16 %v6111_v18, %v6111_v18  ;;  %v6113_v20 = vpop.eup %6112 }
 0x531   :  { %v5147_v21 = vpack.c.bf16 %v6113_v20, %v6113_v20 }
 0x532   :  { %4556 = vst.msk [vmem:[#allocation2 + $0x18] sm:$0xf] %vm4555_vm1, %v5143_v19 }
 0x533   :  { %4560 = vst.msk [vmem:[#allocation2 + $0x34] sm:$0xf] %vm4555_vm1, %v5147_v21 }
 0x54b   :  { %v4333_v2 = vpop.f32.mrb[16].mxu0 }
 0x54c   :  { %v5296_v5 = vadd.f32 %v4333_v2, %v2916_v23  ;;  %v4335_v26 = vpop.f32.mrb[17].mxu0 }
 0x54d   :  { %v5297_v27 = vadd.f32 %v4335_v26, %v2920_v25  ;;  %v4337_v28 = vpop.f32.mrb[18].mxu0 }
 0x54e   :  { %v4428_v29 = vsub.f32 0.0, %v5296_v5  ;;  %v5298_v30 = vadd.f32 %v4337_v28, %v2916_v23  ;;  %v4339_v31 = vpop.f32.mrb[19].mxu0 }
 0x54f   :  { %v4429_v32 = vsub.f32 0.0, %v5297_v27  ;;  %v5299_v33 = vadd.f32 %v4339_v31, %v2920_v25 }
 0x550   :  { %v4446_v34 = vmul.f32 1.442695, %v4428_v29  ;;  %v4435_v35 = vsub.f32 0.0, %v5298_v30 }
 0x551   :  { %v4448_v36 = vmul.f32 1.442695, %v4429_v32  ;;  %v4436_v37 = vsub.f32 0.0, %v5299_v33 }
 0x552   :  { %6114 = vpow2.f32 %v4446_v34  ;;  %v4460_v60 = vmul.f32 1.442695, %v4435_v35 }
 0x553   :  { %6116 = vpow2.f32 %v4448_v36  ;;  %v4462_v38 = vmul.f32 1.442695, %v4436_v37 }
 0x554   :  { %6118 = vpow2.f32 %v4460_v60 }
 0x555   :  { %6120 = vpow2.f32 %v4462_v38 }
 0x55c   :  { %v6115_v50 = vpop.eup %6114 }
 0x55d   :  { %v6117_v39 = vpop.eup %6116  ;;  %v4470_v40 = vadd.f32 1.0, %v6115_v50 }
 0x55e   :  { %v6119_v41 = vpop.eup %6118  ;;  %v4471_v42 = vadd.f32 1.0, %v6117_v39 }
 0x55f   :  { %v6121_v43 = vpop.eup %6120  ;;  %6122 = vrcp.f32 %v4470_v40  ;;  %v4477_v44 = vadd.f32 1.0, %v6119_v41 }
 0x560   :  { %6124 = vrcp.f32 %v4471_v42  ;;  %v4478_v45 = vadd.f32 1.0, %v6121_v43 }
 0x561   :  { %6126 = vrcp.f32 %v4477_v44 }
 0x562   :  { %6128 = vrcp.f32 %v4478_v45 }
 0x569   :  { %v6123_v46 = vpop.eup %6122 }
 0x56a   :  { %v6125_v47 = vpop.eup %6124 }
 0x56b   :  { %v6127_v48 = vpop.eup %6126  ;;  %v5142_v49 = vpack.c.bf16 %v6125_v47, %v6123_v46 }
 0x56c   :  { %v6129_v51 = vpop.eup %6128 }
 0x56d   :  { %4554 = vst [vmem:[#allocation2 + $0x10] sm:$0xff] %v5142_v49  ;;  %v5146_v52 = vpack.c.bf16 %v6129_v51, %v6127_v48 }
 0x56f   :  { %4559 = vst [vmem:[#allocation2 + $0x2c] sm:$0xff] %v5146_v52 }
 0x570   :  { %6185 = shalt.err (!%p6182_p6)
}
 0x571   :  { %s6186_s11 = scalar_lea.hbm %s8012_s12, 896 }
 0x572   :  { %p6187_p7 = scmp.ne.s32.totalorder %s8012_s12, %s6186_s11  ;;  %p6190_p8 = scmp.lt.u32.totalorder %s6186_s11, %s8012_s12 }
 0x574   :  { %p6192_p9 = pnand %p6190_p8, %p6187_p7 }
 0x576   :  { %6195 = shalt.err (!%p6192_p9)
}
 0x577   :  { %s6206_s2 = smov 448   ;;  %s6207_s17 = smov 28  }
 0x578   :  { %4576 = dma.vmem_to_hbm [thread:$0]  %s4571_s0, 896, %s8012_s12, [#allocation3], %s6206_s2, %s6206_s2, %s6207_s17  }
 0x579   :  { %6196 = dma.done.wait [#allocation3], 896  }
 0x57a   :  { %6197 = vsyncadd [#allocation3], 4294966400 }
 0x57b   :  { %6198 = dma.done.wait [#allocation5], 512  }
 0x57c   :  { %6199 = vsyncadd [#allocation5], 4294966784 }
 0x57d   :  { %4610 = vsyncpa [#allocation3], 1 }
 0x57e   :  { %4611 = vsyncpa [#allocation5], 1 }

</bundles_post_ra>
